<compile_context>
chip_gen: v6e
topology: v6e:2x2x1
jax: 0.10.0
libtpu: 0.0.40
codegen_flags: <defaults>
</compile_context>

<pallas_src>
import functools
import inspect

import jax
import jax.numpy as jnp
from jax import lax
from jax.experimental import pallas as pl
from jax.experimental.pallas import tpu as pltpu

EPS = 1e-6
NEG_INF = -1e9


def _pick_tile(n, target, align):
    """Largest divisor of n that is <= target and a multiple of `align`
    (falls back to n itself, i.e. no tiling, if no such divisor exists)."""
    if n <= target:
        return n
    for t in range(min(target, n), align - 1, -1):
        if n % t == 0 and t % align == 0:
            return t
    return n


def _layernorm(x, alpha, bias):
    # PyTorch-style custom LayerNormalization (unbiased std, (std + eps) denom).
    # Exact divide here: LN scales every activation and is the numerically
    # sensitive spot; softmax keeps the approximate EUP reciprocal.
    f = x.shape[-1]
    mean = jnp.mean(x, axis=-1, keepdims=True)
    var = jnp.sum((x - mean) ** 2, axis=-1, keepdims=True) * (1.0 / (f - 1))
    return alpha * (x - mean) / (jnp.sqrt(var) + EPS) + bias


def encoder_block_kernel(n_heads, tq, tk, ffc,
                         x_ref, mask_ref,
                         ln1_a_ref, ln1_b_ref,
                         wq_ref, bq_ref, wk_ref, bk_ref, wv_ref, bv_ref,
                         wo_ref, bo_ref,
                         ln2_a_ref, ln2_b_ref,
                         w1_ref, b1_ref, w2_ref, b2_ref,
                         out_ref):
    bf16 = jnp.bfloat16
    x = x_ref[0]                        # (S, F) f32 -- full sequence (keys/values)
    S, F = x.shape
    d_k = F // n_heads
    n_kb = S // tk
    d_ff = w1_ref.shape[1]
    n_fc = d_ff // ffc

    # Query rows handled by this grid step.
    if tq == S:
        xq = x
    else:
        q_start = pl.multiple_of(pl.program_id(1) * tq, tq)
        xq = x_ref[0, pl.ds(q_start, tq), :]                  # (tq, F) f32

    # ---------- residual connection 1: xq + MHA(LN(x))[query rows] ----------
    xn_full16 = _layernorm(x, ln1_a_ref[...], ln1_b_ref[...]).astype(bf16)
    if tq == S:
        xn_q16 = xn_full16
    else:
        xn_q16 = _layernorm(xq, ln1_a_ref[...], ln1_b_ref[...]).astype(bf16)

    # Projections: bf16 MXU operands, f32 accumulation; K/V over full sequence,
    # Q only for this query tile; 1/sqrt(d_k) folded into q once.
    k16 = (jnp.dot(xn_full16, wk_ref[...], preferred_element_type=jnp.float32)
           + bk_ref[...]).astype(bf16)                        # (S, F)
    v16 = (jnp.dot(xn_full16, wv_ref[...], preferred_element_type=jnp.float32)
           + bv_ref[...]).astype(bf16)                        # (S, F)
    scale = 1.0 / jnp.sqrt(jnp.float32(d_k))
    q16 = ((jnp.dot(xn_q16, wq_ref[...], preferred_element_type=jnp.float32)
            + bq_ref[...]) * scale).astype(bf16)              # (tq, F)

    # Additive mask bias, computed once (no per-head where/broadcast).
    mbias = jnp.where(mask_ref[0] != 0.0, 0.0, NEG_INF).astype(jnp.float32)  # (1,S)

    # Per-head flash-style attention over key blocks: the (tq, S) scores never
    # materialize beyond a (tq, tk) tile, so VMEM stays bounded for long S.
    # TODO(synk): for large F with d_k >= 128, switch q/k/v to an
    # (n_heads, S, d_k) lane-dense layout so per-head slices are not sub-128
    # lane windows of a (S, F) vreg.
    ctx_heads = []
    for h in range(n_heads):            # static, small head count
        hsl = slice(h * d_k, (h + 1) * d_k)
        qh = q16[:, hsl]                # (tq, d_k) bf16
        m_i = jnp.full((tq, 1), -1e30, jnp.float32)
        l_i = jnp.zeros((tq, 1), jnp.float32)
        acc = jnp.zeros((tq, d_k), jnp.float32)
        for j in range(n_kb):           # static key-block loop (online softmax)
            ksl = slice(j * tk, (j + 1) * tk)
            # scores = q . k^T without materializing a transpose
            s = lax.dot_general(qh, k16[ksl, hsl], (((1,), (1,)), ((), ())),
                                preferred_element_type=jnp.float32)   # (tq, tk)
            s = s + mbias[:, ksl]
            m_new = jnp.maximum(m_i, jnp.max(s, axis=-1, keepdims=True))
            a = jnp.exp(m_i - m_new)
            p = jnp.exp(s - m_new)
            l_i = a * l_i + jnp.sum(p, axis=-1, keepdims=True)
            acc = a * acc + jnp.dot(p.astype(bf16), v16[ksl, hsl],
                                    preferred_element_type=jnp.float32)
            m_i = m_new
        ctx_heads.append((acc * pl.reciprocal(l_i, approx=True)).astype(bf16))

    # Single full-F output projection (256-deep MXU gets a full contraction).
    ctx = jnp.concatenate(ctx_heads, axis=-1)                 # (tq, F) bf16
    attn = jnp.dot(ctx, wo_ref[...], preferred_element_type=jnp.float32)
    x1 = xq + attn + bo_ref[...]        # dropout == identity (eval)

    # ---------- residual connection 2: x1 + FFN(LN(x1)) ----------
    # d_ff processed in chunks so the (tq, d_ff) intermediate never fully lives.
    # TODO(synk): for very large d_ff, stream w1/w2 via an "arbitrary" grid axis
    # (BlockSpecs over the d_ff dim) instead of keeping them VMEM-resident.
    xn2_16 = _layernorm(x1, ln2_a_ref[...], ln2_b_ref[...]).astype(bf16)
    ff = jnp.zeros((tq, F), jnp.float32)
    for c in range(n_fc):
        csl = slice(c * ffc, (c + 1) * ffc)
        h1 = (jnp.dot(xn2_16, w1_ref[:, csl], preferred_element_type=jnp.float32)
              + b1_ref[:, csl])
        h1 = jnp.maximum(h1, 0.0).astype(bf16)                # ReLU
        ff = ff + jnp.dot(h1, w2_ref[csl, :], preferred_element_type=jnp.float32)

    out_ref[0] = x1 + ff + b2_ref[...]


_MATRIX_KEYS = ("wq", "wk", "wv", "wo", "w1", "w2")


def _vmem_capacity_bytes():
    try:
        return int(pltpu.get_tpu_info().vmem_capacity_bytes)
    except Exception:
        return 64 * 2**20               # conservative: v7x per-TensorCore VMEM


def encoder_block(x, mask, params, n_heads, *,
                  q_tile=256, k_tile=512, ff_tile=512):
    """x: [B, S, F] f32, mask: [B, 1, S] f32 (1.0 keep / 0.0 mask)."""
    B, S, F = x.shape
    d_ff = params["w1"].shape[1]

    tq = _pick_tile(S, q_tile, 8)       # query rows per grid step
    tk = _pick_tile(S, k_tile, 8)       # key-block size for online softmax
    ffc = _pick_tile(d_ff, ff_tile, 128)  # d_ff chunk (lane-aligned when possible)
    n_q = S // tq

    # bf16 weight matrices for the MXU (accumulation stays f32 in-kernel);
    # LayerNorm params and biases stay f32.
    p = dict(params)
    for name in _MATRIX_KEYS:
        p[name] = p[name].astype(jnp.bfloat16)

    param_list = [
        p["ln1_a"], p["ln1_b"],
        p["wq"], p["bq"], p["wk"], p["bk"],
        p["wv"], p["bv"], p["wo"], p["bo"],
        p["ln2_a"], p["ln2_b"],
        p["w1"], p["b1"], p["w2"], p["b2"],
    ]

    try:
        has_pipeline_mode = (
            hasattr(pl, "Buffered")
            and "pipeline_mode" in inspect.signature(pl.BlockSpec).parameters)
    except (TypeError, ValueError):
        has_pipeline_mode = False

    def build_specs(single_buffer_params):
        def full_spec(arr):
            nd = arr.ndim
            idx = lambda b, q, _nd=nd: (0,) * _nd
            if single_buffer_params:
                return pl.BlockSpec(arr.shape, idx, pipeline_mode=pl.Buffered(1))
            return pl.BlockSpec(arr.shape, idx)

        in_specs = [
            pl.BlockSpec((1, S, F), lambda b, q: (b, 0, 0)),   # x: full row (K/V)
            pl.BlockSpec((1, 1, S), lambda b, q: (b, 0, 0)),   # mask
        ] + [full_spec(arr) for arr in param_list]
        out_specs = pl.BlockSpec((1, tq, F), lambda b, q: (b, q, 0))
        return in_specs, out_specs

    kernel = functools.partial(encoder_block_kernel, n_heads, tq, tk, ffc)
    vmem_cap = _vmem_capacity_bytes()

    def run(single_buffer_params):
        # Explicit scoped-VMEM limit sized to the working set, capped per
        # generation at ~0.8x physical VMEM (v7x has only 64 MiB / TC).
        nbytes = lambda a: a.size * a.dtype.itemsize
        weight_bytes = sum(nbytes(a) for a in param_list)
        if not single_buffer_params:
            weight_bytes *= 2                               # default double buffering
        io_bytes = 2 * (S * F * 4 + S * 4 + tq * F * 4)     # x / mask / out (dbl-buf)
        scratch_bytes = 4 * (6 * S * F                      # LN(x), k16, v16 temps
                             + 10 * tq * F                  # q, ctx, attn, residual, ff
                             + 6 * tq * tk                  # per-head score tile
                             + 3 * tq * ffc)                # ffn chunk
        want = 2 * (weight_bytes + io_bytes + scratch_bytes)
        vmem_limit = int(min(0.8 * vmem_cap, max(16 * 2**20, want)))

        in_specs, out_specs = build_specs(single_buffer_params)
        return pl.pallas_call(
            kernel,
            out_shape=jax.ShapeDtypeStruct((B, S, F), jnp.float32),
            grid_spec=pltpu.PrefetchScalarGridSpec(
                num_scalar_prefetch=0,
                grid=(B, n_q),
                in_specs=in_specs,
                out_specs=out_specs,
            ),
            compiler_params=pltpu.CompilerParams(
                dimension_semantics=("parallel", "parallel"),
                vmem_limit_bytes=vmem_limit),
        )(x, mask, *param_list)

    if has_pipeline_mode:
        try:
            return run(True)
        except (pltpu.LoweringException, NotImplementedError, TypeError, ValueError):
            pass   # Buffered(1) single-buffering unsupported -> double-buffer weights
    return run(False)


# ---------------------------- pure-JAX reference ----------------------------
def _ref_layernorm(x, a, b):
    f = x.shape[-1]
    mean = jnp.mean(x, axis=-1, keepdims=True)
    var = jnp.sum((x - mean) ** 2, axis=-1, keepdims=True) / (f - 1)
    return a * (x - mean) / (jnp.sqrt(var) + EPS) + b


def encoder_block_reference(x, mask, params, n_heads):
    B, S, F = x.shape
    d_k = F // n_heads
    p = {k: v.astype(jnp.float32) for k, v in params.items()}
    xn = _ref_layernorm(x, p["ln1_a"], p["ln1_b"])
    q = xn @ p["wq"] + p["bq"]
    k = xn @ p["wk"] + p["bk"]
    v = xn @ p["wv"] + p["bv"]
    split = lambda t: t.reshape(B, S, n_heads, d_k).transpose(0, 2, 1, 3)
    qh, kh, vh = split(q), split(k), split(v)
    scores = jnp.einsum("bhsd,bhtd->bhst", qh, kh) / jnp.sqrt(jnp.float32(d_k))
    scores = jnp.where(mask[:, None, :, :] == 0.0, NEG_INF, scores)
    attn = jnp.einsum("bhst,bhtd->bhsd", jax.nn.softmax(scores, axis=-1), vh)
    attn = attn.transpose(0, 2, 1, 3).reshape(B, S, F)
    x = x + attn @ p["wo"] + p["bo"]
    xn2 = _ref_layernorm(x, p["ln2_a"], p["ln2_b"])
    h1 = jnp.maximum(xn2 @ p["w1"] + p["b1"], 0.0)
    return x + h1 @ p["w2"] + p["b2"]


def init_params(key, features, d_ff):
    ks = jax.random.split(key, 12)
    s = 0.05
    return {
        # LayerNorm 1
        "ln1_a": jnp.ones((1, features), jnp.float32),
        "ln1_b": jnp.zeros((1, features), jnp.float32),
        # MultiHeadAttention projections ([in, out]; y = x @ W + b)
        "wq": s * jax.random.normal(ks[0], (features, features), jnp.float32),
        "bq": s * jax.random.normal(ks[1], (1, features), jnp.float32),
        "wk": s * jax.random.normal(ks[2], (features, features), jnp.float32),
        "bk": s * jax.random.normal(ks[3], (1, features), jnp.float32),
        "wv": s * jax.random.normal(ks[4], (features, features), jnp.float32),
        "bv": s * jax.random.normal(ks[5], (1, features), jnp.float32),
        "wo": s * jax.random.normal(ks[6], (features, features), jnp.float32),
        "bo": s * jax.random.normal(ks[7], (1, features), jnp.float32),
        # LayerNorm 2
        "ln2_a": jnp.ones((1, features), jnp.float32),
        "ln2_b": jnp.zeros((1, features), jnp.float32),
        # FeedForwardBlock: Linear(F, d_ff) -> ReLU -> Linear(d_ff, F)
        "w1": s * jax.random.normal(ks[8], (features, d_ff), jnp.float32),
        "b1": s * jax.random.normal(ks[9], (1, d_ff), jnp.float32),
        "w2": s * jax.random.normal(ks[10], (d_ff, features), jnp.float32),
        "b2": s * jax.random.normal(ks[11], (1, features), jnp.float32),
    }


if __name__ == "__main__":
    B, S, F, H, D_FF = 2, 8, 32, 4, 64

    key = jax.random.PRNGKey(0)
    kx, kp, km = jax.random.split(key, 3)

    x = jax.random.normal(kx, (B, S, F), jnp.float32)
    # src_mask: mask out the last 2 key positions of batch element 1
    mask = jnp.ones((B, 1, S), jnp.float32)
    mask = mask.at[1, 0, S - 2:].set(0.0)

    params = init_params(kp, F, D_FF)

    out = encoder_block(x, mask, params, H)
    out = jax.block_until_ready(out)
    assert out.shape == (B, S, F)
    assert jnp.all(jnp.isfinite(out))

    # Loose correctness check vs. f32 reference (kernel uses bf16 MXU operands,
    # an additive -1e9 mask bias and approx EUP softmax reciprocal).
    ref = encoder_block_reference(x, mask, params, H)
    max_err = float(jnp.max(jnp.abs(out - ref)))
    assert max_err < 5e-2, f"max abs error vs reference: {max_err}"

    print("KERNEL_OK")
</pallas_src>

<mosaic_0001>
module attributes {stable_mosaic.version = 11 : i64} {
  func.func @encoder_block_kernel(%arg0: i32, %arg1: i32, %arg2: memref<1x8x32xf32, #tpu.memory_space<vmem>>, %arg3: memref<1x1x8xf32, #tpu.memory_space<vmem>>, %arg4: memref<1x32xf32, #tpu.memory_space<vmem>>, %arg5: memref<1x32xf32, #tpu.memory_space<vmem>>, %arg6: memref<32x32xbf16, #tpu.memory_space<vmem>>, %arg7: memref<1x32xf32, #tpu.memory_space<vmem>>, %arg8: memref<32x32xbf16, #tpu.memory_space<vmem>>, %arg9: memref<1x32xf32, #tpu.memory_space<vmem>>, %arg10: memref<32x32xbf16, #tpu.memory_space<vmem>>, %arg11: memref<1x32xf32, #tpu.memory_space<vmem>>, %arg12: memref<32x32xbf16, #tpu.memory_space<vmem>>, %arg13: memref<1x32xf32, #tpu.memory_space<vmem>>, %arg14: memref<1x32xf32, #tpu.memory_space<vmem>>, %arg15: memref<1x32xf32, #tpu.memory_space<vmem>>, %arg16: memref<32x64xbf16, #tpu.memory_space<vmem>>, %arg17: memref<1x64xf32, #tpu.memory_space<vmem>>, %arg18: memref<64x32xbf16, #tpu.memory_space<vmem>>, %arg19: memref<1x32xf32, #tpu.memory_space<vmem>>, %arg20: memref<1x8x32xf32, #tpu.memory_space<vmem>>) attributes {dimension_semantics = [#tpu.dimension_semantics<parallel>, #tpu.dimension_semantics<parallel>], iteration_bounds = array<i64: 2, 1>, scalar_prefetch = 0 : i64, scratch_operands = 0 : i64, tpu.core_type = #tpu.core_type<tc>, window_params = [{transform_indices = @transform_0, window_bounds = array<i64: 1, 8, 32>}, {transform_indices = @transform_1, window_bounds = array<i64: 1, 1, 8>}, {pipeline_mode = #tpu.pipeline_mode<synchronous>, transform_indices = @transform_2, window_bounds = array<i64: 1, 32>}, {pipeline_mode = #tpu.pipeline_mode<synchronous>, transform_indices = @transform_3, window_bounds = array<i64: 1, 32>}, {pipeline_mode = #tpu.pipeline_mode<synchronous>, transform_indices = @transform_4, window_bounds = array<i64: 32, 32>}, {pipeline_mode = #tpu.pipeline_mode<synchronous>, transform_indices = @transform_5, window_bounds = array<i64: 1, 32>}, {pipeline_mode = #tpu.pipeline_mode<synchronous>, transform_indices = @transform_6, window_bounds = array<i64: 32, 32>}, {pipeline_mode = #tpu.pipeline_mode<synchronous>, transform_indices = @transform_7, window_bounds = array<i64: 1, 32>}, {pipeline_mode = #tpu.pipeline_mode<synchronous>, transform_indices = @transform_8, window_bounds = array<i64: 32, 32>}, {pipeline_mode = #tpu.pipeline_mode<synchronous>, transform_indices = @transform_9, window_bounds = array<i64: 1, 32>}, {pipeline_mode = #tpu.pipeline_mode<synchronous>, transform_indices = @transform_10, window_bounds = array<i64: 32, 32>}, {pipeline_mode = #tpu.pipeline_mode<synchronous>, transform_indices = @transform_11, window_bounds = array<i64: 1, 32>}, {pipeline_mode = #tpu.pipeline_mode<synchronous>, transform_indices = @transform_12, window_bounds = array<i64: 1, 32>}, {pipeline_mode = #tpu.pipeline_mode<synchronous>, transform_indices = @transform_13, window_bounds = array<i64: 1, 32>}, {pipeline_mode = #tpu.pipeline_mode<synchronous>, transform_indices = @transform_14, window_bounds = array<i64: 32, 64>}, {pipeline_mode = #tpu.pipeline_mode<synchronous>, transform_indices = @transform_15, window_bounds = array<i64: 1, 64>}, {pipeline_mode = #tpu.pipeline_mode<synchronous>, transform_indices = @transform_16, window_bounds = array<i64: 64, 32>}, {pipeline_mode = #tpu.pipeline_mode<synchronous>, transform_indices = @transform_17, window_bounds = array<i64: 1, 32>}, {transform_indices = @transform_18, window_bounds = array<i64: 1, 8, 32>}]} {
    %c0 = arith.constant 0 : index
    %c0_0 = arith.constant 0 : index
    %c0_1 = arith.constant 0 : index
    %0 = vector.load %arg2[%c0, %c0_0, %c0_1] : memref<1x8x32xf32, #tpu.memory_space<vmem>>, vector<1x8x32xf32>
    %1 = vector.shape_cast %0 : vector<1x8x32xf32> to vector<8x32xf32>
    %c0_2 = arith.constant 0 : index
    %c0_3 = arith.constant 0 : index
    %2 = vector.load %arg4[%c0_2, %c0_3] : memref<1x32xf32, #tpu.memory_space<vmem>>, vector<1x32xf32>
    %c0_4 = arith.constant 0 : index
    %c0_5 = arith.constant 0 : index
    %3 = vector.load %arg5[%c0_4, %c0_5] : memref<1x32xf32, #tpu.memory_space<vmem>>, vector<1x32xf32>
    %cst = arith.constant dense<0.000000e+00> : vector<8xf32>
    %4 = vector.multi_reduction <add>, %1, %cst [1] : vector<8x32xf32> to vector<8xf32>
    %5 = vector.shape_cast %4 : vector<8xf32> to vector<8x1xf32>
    %cst_6 = arith.constant 3.200000e+01 : f32
    %6 = vector.broadcast %cst_6 : f32 to vector<8x1xf32>
    %7 = arith.divf %5, %6 : vector<8x1xf32>
    %8 = vector.broadcast %7 : vector<8x1xf32> to vector<8x32xf32>
    %9 = arith.subf %1, %8 : vector<8x32xf32>
    %10 = arith.mulf %9, %9 : vector<8x32xf32>
    %cst_7 = arith.constant dense<0.000000e+00> : vector<8xf32>
    %11 = vector.multi_reduction <add>, %10, %cst_7 [1] : vector<8x32xf32> to vector<8xf32>
    %12 = vector.shape_cast %11 : vector<8xf32> to vector<8x1xf32>
    %cst_8 = arith.constant 0.0322580636 : f32
    %13 = vector.broadcast %cst_8 : f32 to vector<8x1xf32>
    %14 = arith.mulf %12, %13 : vector<8x1xf32>
    %15 = vector.broadcast %7 : vector<8x1xf32> to vector<8x32xf32>
    %16 = arith.subf %1, %15 : vector<8x32xf32>
    %17 = vector.broadcast %2 : vector<1x32xf32> to vector<8x32xf32>
    %18 = arith.mulf %17, %16 : vector<8x32xf32>
    %19 = math.sqrt %14 : vector<8x1xf32>
    %cst_9 = arith.constant 9.99999997E-7 : f32
    %20 = vector.broadcast %cst_9 : f32 to vector<8x1xf32>
    %21 = arith.addf %19, %20 : vector<8x1xf32>
    %22 = vector.broadcast %21 : vector<8x1xf32> to vector<8x32xf32>
    %23 = arith.divf %18, %22 : vector<8x32xf32>
    %24 = vector.broadcast %3 : vector<1x32xf32> to vector<8x32xf32>
    %25 = arith.addf %23, %24 : vector<8x32xf32>
    %26 = arith.truncf %25 : vector<8x32xf32> to vector<8x32xbf16>
    %c0_10 = arith.constant 0 : index
    %c0_11 = arith.constant 0 : index
    %27 = vector.load %arg8[%c0_10, %c0_11] : memref<32x32xbf16, #tpu.memory_space<vmem>>, vector<32x32xbf16>
    %cst_12 = arith.constant dense<0.000000e+00> : vector<8x32xf32>
    %28 = tpu.matmul %26, %27, %cst_12 {dimension_numbers = #tpu.dot_dimension_numbers<[1], [0], [0], [1], [0, 0, 1, 1], [], []>} : vector<8x32xbf16>, vector<32x32xbf16>, vector<8x32xf32> -> vector<8x32xf32>
    %c0_13 = arith.constant 0 : index
    %c0_14 = arith.constant 0 : index
    %29 = vector.load %arg9[%c0_13, %c0_14] : memref<1x32xf32, #tpu.memory_space<vmem>>, vector<1x32xf32>
    %30 = vector.broadcast %29 : vector<1x32xf32> to vector<8x32xf32>
    %31 = arith.addf %28, %30 : vector<8x32xf32>
    %32 = arith.truncf %31 : vector<8x32xf32> to vector<8x32xbf16>
    %c0_15 = arith.constant 0 : index
    %c0_16 = arith.constant 0 : index
    %33 = vector.load %arg10[%c0_15, %c0_16] : memref<32x32xbf16, #tpu.memory_space<vmem>>, vector<32x32xbf16>
    %cst_17 = arith.constant dense<0.000000e+00> : vector<8x32xf32>
    %34 = tpu.matmul %26, %33, %cst_17 {dimension_numbers = #tpu.dot_dimension_numbers<[1], [0], [0], [1], [0, 0, 1, 1], [], []>} : vector<8x32xbf16>, vector<32x32xbf16>, vector<8x32xf32> -> vector<8x32xf32>
    %c0_18 = arith.constant 0 : index
    %c0_19 = arith.constant 0 : index
    %35 = vector.load %arg11[%c0_18, %c0_19] : memref<1x32xf32, #tpu.memory_space<vmem>>, vector<1x32xf32>
    %36 = vector.broadcast %35 : vector<1x32xf32> to vector<8x32xf32>
    %37 = arith.addf %34, %36 : vector<8x32xf32>
    %38 = arith.truncf %37 : vector<8x32xf32> to vector<8x32xbf16>
    %cst_20 = arith.constant 8.000000e+00 : f32
    %39 = math.sqrt %cst_20 : f32
    %cst_21 = arith.constant 1.000000e+00 : f32
    %40 = arith.divf %cst_21, %39 : f32
    %c0_22 = arith.constant 0 : index
    %c0_23 = arith.constant 0 : index
    %41 = vector.load %arg6[%c0_22, %c0_23] : memref<32x32xbf16, #tpu.memory_space<vmem>>, vector<32x32xbf16>
    %cst_24 = arith.constant dense<0.000000e+00> : vector<8x32xf32>
    %42 = tpu.matmul %26, %41, %cst_24 {dimension_numbers = #tpu.dot_dimension_numbers<[1], [0], [0], [1], [0, 0, 1, 1], [], []>} : vector<8x32xbf16>, vector<32x32xbf16>, vector<8x32xf32> -> vector<8x32xf32>
    %c0_25 = arith.constant 0 : index
    %c0_26 = arith.constant 0 : index
    %43 = vector.load %arg7[%c0_25, %c0_26] : memref<1x32xf32, #tpu.memory_space<vmem>>, vector<1x32xf32>
    %44 = vector.broadcast %43 : vector<1x32xf32> to vector<8x32xf32>
    %45 = arith.addf %42, %44 : vector<8x32xf32>
    %46 = vector.broadcast %40 : f32 to vector<8x32xf32>
    %47 = arith.mulf %45, %46 : vector<8x32xf32>
    %48 = arith.truncf %47 : vector<8x32xf32> to vector<8x32xbf16>
    %c0_27 = arith.constant 0 : index
    %c0_28 = arith.constant 0 : index
    %c0_29 = arith.constant 0 : index
    %49 = vector.load %arg3[%c0_27, %c0_28, %c0_29] : memref<1x1x8xf32, #tpu.memory_space<vmem>>, vector<1x1x8xf32>
    %50 = vector.shape_cast %49 : vector<1x1x8xf32> to vector<1x8xf32>
    %cst_30 = arith.constant 0.000000e+00 : f32
    %51 = vector.broadcast %cst_30 : f32 to vector<1x8xf32>
    %52 = arith.cmpf one, %50, %51 : vector<1x8xf32>
    %cst_31 = arith.constant 0.000000e+00 : f32
    %cst_32 = arith.constant -1.000000e+09 : f32
    %53 = vector.broadcast %cst_31 : f32 to vector<1x8xf32>
    %54 = vector.broadcast %cst_32 : f32 to vector<1x8xf32>
    %55 = arith.select %52, %53, %54 : vector<1x8xi1>, vector<1x8xf32>
    %56 = vector.extract_strided_slice %48 {offsets = [0, 0], sizes = [8, 8], strides = [1, 1]} : vector<8x32xbf16> to vector<8x8xbf16>
    %cst_33 = arith.constant -1.000000e+30 : f32
    %57 = vector.broadcast %cst_33 : f32 to vector<8x1xf32>
    %cst_34 = arith.constant 0.000000e+00 : f32
    %58 = vector.broadcast %cst_34 : f32 to vector<8x1xf32>
    %cst_35 = arith.constant 0.000000e+00 : f32
    %59 = vector.broadcast %cst_35 : f32 to vector<8x8xf32>
    %60 = vector.extract_strided_slice %32 {offsets = [0, 0], sizes = [8, 8], strides = [1, 1]} : vector<8x32xbf16> to vector<8x8xbf16>
    %cst_36 = arith.constant dense<0.000000e+00> : vector<8x8xf32>
    %61 = tpu.matmul %56, %60, %cst_36 {dimension_numbers = #tpu.dot_dimension_numbers<[1], [1], [0], [0], [0, 0, 1, 0], [], []>} : vector<8x8xbf16>, vector<8x8xbf16>, vector<8x8xf32> -> vector<8x8xf32>
    %62 = vector.broadcast %55 : vector<1x8xf32> to vector<8x8xf32>
    %63 = arith.addf %61, %62 : vector<8x8xf32>
    %cst_37 = arith.constant dense<0xFF800000> : vector<8xf32>
    %64 = vector.multi_reduction <maximumf>, %63, %cst_37 [1] : vector<8x8xf32> to vector<8xf32>
    %65 = vector.shape_cast %64 : vector<8xf32> to vector<8x1xf32>
    %66 = arith.maximumf %57, %65 : vector<8x1xf32>
    %67 = arith.subf %57, %66 : vector<8x1xf32>
    %68 = math.exp %67 : vector<8x1xf32>
    %69 = vector.broadcast %66 : vector<8x1xf32> to vector<8x8xf32>
    %70 = arith.subf %63, %69 : vector<8x8xf32>
    %71 = math.exp %70 : vector<8x8xf32>
    %72 = arith.mulf %68, %58 : vector<8x1xf32>
    %cst_38 = arith.constant dense<0.000000e+00> : vector<8xf32>
    %73 = vector.multi_reduction <add>, %71, %cst_38 [1] : vector<8x8xf32> to vector<8xf32>
    %74 = vector.shape_cast %73 : vector<8xf32> to vector<8x1xf32>
    %75 = arith.addf %72, %74 : vector<8x1xf32>
    %76 = vector.broadcast %68 : vector<8x1xf32> to vector<8x8xf32>
    %77 = arith.mulf %76, %59 : vector<8x8xf32>
    %78 = arith.truncf %71 : vector<8x8xf32> to vector<8x8xbf16>
    %79 = vector.extract_strided_slice %38 {offsets = [0, 0], sizes = [8, 8], strides = [1, 1]} : vector<8x32xbf16> to vector<8x8xbf16>
    %cst_39 = arith.constant dense<0.000000e+00> : vector<8x8xf32>
    %80 = tpu.matmul %78, %79, %cst_39 {dimension_numbers = #tpu.dot_dimension_numbers<[1], [0], [0], [1], [0, 0, 1, 1], [], []>} : vector<8x8xbf16>, vector<8x8xbf16>, vector<8x8xf32> -> vector<8x8xf32>
    %81 = arith.addf %77, %80 : vector<8x8xf32>
    %82 = tpu.reciprocal %75 {approx = true} : vector<8x1xf32> -> vector<8x1xf32>
    %83 = vector.broadcast %82 : vector<8x1xf32> to vector<8x8xf32>
    %84 = arith.mulf %81, %83 : vector<8x8xf32>
    %85 = arith.truncf %84 : vector<8x8xf32> to vector<8x8xbf16>
    %86 = vector.extract_strided_slice %48 {offsets = [0, 8], sizes = [8, 8], strides = [1, 1]} : vector<8x32xbf16> to vector<8x8xbf16>
    %cst_40 = arith.constant -1.000000e+30 : f32
    %87 = vector.broadcast %cst_40 : f32 to vector<8x1xf32>
    %cst_41 = arith.constant 0.000000e+00 : f32
    %88 = vector.broadcast %cst_41 : f32 to vector<8x1xf32>
    %cst_42 = arith.constant 0.000000e+00 : f32
    %89 = vector.broadcast %cst_42 : f32 to vector<8x8xf32>
    %90 = vector.extract_strided_slice %32 {offsets = [0, 8], sizes = [8, 8], strides = [1, 1]} : vector<8x32xbf16> to vector<8x8xbf16>
    %cst_43 = arith.constant dense<0.000000e+00> : vector<8x8xf32>
    %91 = tpu.matmul %86, %90, %cst_43 {dimension_numbers = #tpu.dot_dimension_numbers<[1], [1], [0], [0], [0, 0, 1, 0], [], []>} : vector<8x8xbf16>, vector<8x8xbf16>, vector<8x8xf32> -> vector<8x8xf32>
    %92 = vector.broadcast %55 : vector<1x8xf32> to vector<8x8xf32>
    %93 = arith.addf %91, %92 : vector<8x8xf32>
    %cst_44 = arith.constant dense<0xFF800000> : vector<8xf32>
    %94 = vector.multi_reduction <maximumf>, %93, %cst_44 [1] : vector<8x8xf32> to vector<8xf32>
    %95 = vector.shape_cast %94 : vector<8xf32> to vector<8x1xf32>
    %96 = arith.maximumf %87, %95 : vector<8x1xf32>
    %97 = arith.subf %87, %96 : vector<8x1xf32>
    %98 = math.exp %97 : vector<8x1xf32>
    %99 = vector.broadcast %96 : vector<8x1xf32> to vector<8x8xf32>
    %100 = arith.subf %93, %99 : vector<8x8xf32>
    %101 = math.exp %100 : vector<8x8xf32>
    %102 = arith.mulf %98, %88 : vector<8x1xf32>
    %cst_45 = arith.constant dense<0.000000e+00> : vector<8xf32>
    %103 = vector.multi_reduction <add>, %101, %cst_45 [1] : vector<8x8xf32> to vector<8xf32>
    %104 = vector.shape_cast %103 : vector<8xf32> to vector<8x1xf32>
    %105 = arith.addf %102, %104 : vector<8x1xf32>
    %106 = vector.broadcast %98 : vector<8x1xf32> to vector<8x8xf32>
    %107 = arith.mulf %106, %89 : vector<8x8xf32>
    %108 = arith.truncf %101 : vector<8x8xf32> to vector<8x8xbf16>
    %109 = vector.extract_strided_slice %38 {offsets = [0, 8], sizes = [8, 8], strides = [1, 1]} : vector<8x32xbf16> to vector<8x8xbf16>
    %cst_46 = arith.constant dense<0.000000e+00> : vector<8x8xf32>
    %110 = tpu.matmul %108, %109, %cst_46 {dimension_numbers = #tpu.dot_dimension_numbers<[1], [0], [0], [1], [0, 0, 1, 1], [], []>} : vector<8x8xbf16>, vector<8x8xbf16>, vector<8x8xf32> -> vector<8x8xf32>
    %111 = arith.addf %107, %110 : vector<8x8xf32>
    %112 = tpu.reciprocal %105 {approx = true} : vector<8x1xf32> -> vector<8x1xf32>
    %113 = vector.broadcast %112 : vector<8x1xf32> to vector<8x8xf32>
    %114 = arith.mulf %111, %113 : vector<8x8xf32>
    %115 = arith.truncf %114 : vector<8x8xf32> to vector<8x8xbf16>
    %116 = vector.extract_strided_slice %48 {offsets = [0, 16], sizes = [8, 8], strides = [1, 1]} : vector<8x32xbf16> to vector<8x8xbf16>
    %cst_47 = arith.constant -1.000000e+30 : f32
    %117 = vector.broadcast %cst_47 : f32 to vector<8x1xf32>
    %cst_48 = arith.constant 0.000000e+00 : f32
    %118 = vector.broadcast %cst_48 : f32 to vector<8x1xf32>
    %cst_49 = arith.constant 0.000000e+00 : f32
    %119 = vector.broadcast %cst_49 : f32 to vector<8x8xf32>
    %120 = vector.extract_strided_slice %32 {offsets = [0, 16], sizes = [8, 8], strides = [1, 1]} : vector<8x32xbf16> to vector<8x8xbf16>
    %cst_50 = arith.constant dense<0.000000e+00> : vector<8x8xf32>
    %121 = tpu.matmul %116, %120, %cst_50 {dimension_numbers = #tpu.dot_dimension_numbers<[1], [1], [0], [0], [0, 0, 1, 0], [], []>} : vector<8x8xbf16>, vector<8x8xbf16>, vector<8x8xf32> -> vector<8x8xf32>
    %122 = vector.broadcast %55 : vector<1x8xf32> to vector<8x8xf32>
    %123 = arith.addf %121, %122 : vector<8x8xf32>
    %cst_51 = arith.constant dense<0xFF800000> : vector<8xf32>
    %124 = vector.multi_reduction <maximumf>, %123, %cst_51 [1] : vector<8x8xf32> to vector<8xf32>
    %125 = vector.shape_cast %124 : vector<8xf32> to vector<8x1xf32>
    %126 = arith.maximumf %117, %125 : vector<8x1xf32>
    %127 = arith.subf %117, %126 : vector<8x1xf32>
    %128 = math.exp %127 : vector<8x1xf32>
    %129 = vector.broadcast %126 : vector<8x1xf32> to vector<8x8xf32>
    %130 = arith.subf %123, %129 : vector<8x8xf32>
    %131 = math.exp %130 : vector<8x8xf32>
    %132 = arith.mulf %128, %118 : vector<8x1xf32>
    %cst_52 = arith.constant dense<0.000000e+00> : vector<8xf32>
    %133 = vector.multi_reduction <add>, %131, %cst_52 [1] : vector<8x8xf32> to vector<8xf32>
    %134 = vector.shape_cast %133 : vector<8xf32> to vector<8x1xf32>
    %135 = arith.addf %132, %134 : vector<8x1xf32>
    %136 = vector.broadcast %128 : vector<8x1xf32> to vector<8x8xf32>
    %137 = arith.mulf %136, %119 : vector<8x8xf32>
    %138 = arith.truncf %131 : vector<8x8xf32> to vector<8x8xbf16>
    %139 = vector.extract_strided_slice %38 {offsets = [0, 16], sizes = [8, 8], strides = [1, 1]} : vector<8x32xbf16> to vector<8x8xbf16>
    %cst_53 = arith.constant dense<0.000000e+00> : vector<8x8xf32>
    %140 = tpu.matmul %138, %139, %cst_53 {dimension_numbers = #tpu.dot_dimension_numbers<[1], [0], [0], [1], [0, 0, 1, 1], [], []>} : vector<8x8xbf16>, vector<8x8xbf16>, vector<8x8xf32> -> vector<8x8xf32>
    %141 = arith.addf %137, %140 : vector<8x8xf32>
    %142 = tpu.reciprocal %135 {approx = true} : vector<8x1xf32> -> vector<8x1xf32>
    %143 = vector.broadcast %142 : vector<8x1xf32> to vector<8x8xf32>
    %144 = arith.mulf %141, %143 : vector<8x8xf32>
    %145 = arith.truncf %144 : vector<8x8xf32> to vector<8x8xbf16>
    %146 = vector.extract_strided_slice %48 {offsets = [0, 24], sizes = [8, 8], strides = [1, 1]} : vector<8x32xbf16> to vector<8x8xbf16>
    %cst_54 = arith.constant -1.000000e+30 : f32
    %147 = vector.broadcast %cst_54 : f32 to vector<8x1xf32>
    %cst_55 = arith.constant 0.000000e+00 : f32
    %148 = vector.broadcast %cst_55 : f32 to vector<8x1xf32>
    %cst_56 = arith.constant 0.000000e+00 : f32
    %149 = vector.broadcast %cst_56 : f32 to vector<8x8xf32>
    %150 = vector.extract_strided_slice %32 {offsets = [0, 24], sizes = [8, 8], strides = [1, 1]} : vector<8x32xbf16> to vector<8x8xbf16>
    %cst_57 = arith.constant dense<0.000000e+00> : vector<8x8xf32>
    %151 = tpu.matmul %146, %150, %cst_57 {dimension_numbers = #tpu.dot_dimension_numbers<[1], [1], [0], [0], [0, 0, 1, 0], [], []>} : vector<8x8xbf16>, vector<8x8xbf16>, vector<8x8xf32> -> vector<8x8xf32>
    %152 = vector.broadcast %55 : vector<1x8xf32> to vector<8x8xf32>
    %153 = arith.addf %151, %152 : vector<8x8xf32>
    %cst_58 = arith.constant dense<0xFF800000> : vector<8xf32>
    %154 = vector.multi_reduction <maximumf>, %153, %cst_58 [1] : vector<8x8xf32> to vector<8xf32>
    %155 = vector.shape_cast %154 : vector<8xf32> to vector<8x1xf32>
    %156 = arith.maximumf %147, %155 : vector<8x1xf32>
    %157 = arith.subf %147, %156 : vector<8x1xf32>
    %158 = math.exp %157 : vector<8x1xf32>
    %159 = vector.broadcast %156 : vector<8x1xf32> to vector<8x8xf32>
    %160 = arith.subf %153, %159 : vector<8x8xf32>
    %161 = math.exp %160 : vector<8x8xf32>
    %162 = arith.mulf %158, %148 : vector<8x1xf32>
    %cst_59 = arith.constant dense<0.000000e+00> : vector<8xf32>
    %163 = vector.multi_reduction <add>, %161, %cst_59 [1] : vector<8x8xf32> to vector<8xf32>
    %164 = vector.shape_cast %163 : vector<8xf32> to vector<8x1xf32>
    %165 = arith.addf %162, %164 : vector<8x1xf32>
    %166 = vector.broadcast %158 : vector<8x1xf32> to vector<8x8xf32>
    %167 = arith.mulf %166, %149 : vector<8x8xf32>
    %168 = arith.truncf %161 : vector<8x8xf32> to vector<8x8xbf16>
    %169 = vector.extract_strided_slice %38 {offsets = [0, 24], sizes = [8, 8], strides = [1, 1]} : vector<8x32xbf16> to vector<8x8xbf16>
    %cst_60 = arith.constant dense<0.000000e+00> : vector<8x8xf32>
    %170 = tpu.matmul %168, %169, %cst_60 {dimension_numbers = #tpu.dot_dimension_numbers<[1], [0], [0], [1], [0, 0, 1, 1], [], []>} : vector<8x8xbf16>, vector<8x8xbf16>, vector<8x8xf32> -> vector<8x8xf32>
    %171 = arith.addf %167, %170 : vector<8x8xf32>
    %172 = tpu.reciprocal %165 {approx = true} : vector<8x1xf32> -> vector<8x1xf32>
    %173 = vector.broadcast %172 : vector<8x1xf32> to vector<8x8xf32>
    %174 = arith.mulf %171, %173 : vector<8x8xf32>
    %175 = arith.truncf %174 : vector<8x8xf32> to vector<8x8xbf16>
    %176 = tpu.concatenate %85, %115, %145, %175 in 1 : vector<8x8xbf16>, vector<8x8xbf16>, vector<8x8xbf16>, vector<8x8xbf16> -> vector<8x32xbf16>
    %c0_61 = arith.constant 0 : index
    %c0_62 = arith.constant 0 : index
    %177 = vector.load %arg12[%c0_61, %c0_62] : memref<32x32xbf16, #tpu.memory_space<vmem>>, vector<32x32xbf16>
    %cst_63 = arith.constant dense<0.000000e+00> : vector<8x32xf32>
    %178 = tpu.matmul %176, %177, %cst_63 {dimension_numbers = #tpu.dot_dimension_numbers<[1], [0], [0], [1], [0, 0, 1, 1], [], []>} : vector<8x32xbf16>, vector<32x32xbf16>, vector<8x32xf32> -> vector<8x32xf32>
    %179 = arith.addf %1, %178 : vector<8x32xf32>
    %c0_64 = arith.constant 0 : index
    %c0_65 = arith.constant 0 : index
    %180 = vector.load %arg13[%c0_64, %c0_65] : memref<1x32xf32, #tpu.memory_space<vmem>>, vector<1x32xf32>
    %181 = vector.broadcast %180 : vector<1x32xf32> to vector<8x32xf32>
    %182 = arith.addf %179, %181 : vector<8x32xf32>
    %c0_66 = arith.constant 0 : index
    %c0_67 = arith.constant 0 : index
    %183 = vector.load %arg14[%c0_66, %c0_67] : memref<1x32xf32, #tpu.memory_space<vmem>>, vector<1x32xf32>
    %c0_68 = arith.constant 0 : index
    %c0_69 = arith.constant 0 : index
    %184 = vector.load %arg15[%c0_68, %c0_69] : memref<1x32xf32, #tpu.memory_space<vmem>>, vector<1x32xf32>
    %cst_70 = arith.constant dense<0.000000e+00> : vector<8xf32>
    %185 = vector.multi_reduction <add>, %182, %cst_70 [1] : vector<8x32xf32> to vector<8xf32>
    %186 = vector.shape_cast %185 : vector<8xf32> to vector<8x1xf32>
    %cst_71 = arith.constant 3.200000e+01 : f32
    %187 = vector.broadcast %cst_71 : f32 to vector<8x1xf32>
    %188 = arith.divf %186, %187 : vector<8x1xf32>
    %189 = vector.broadcast %188 : vector<8x1xf32> to vector<8x32xf32>
    %190 = arith.subf %182, %189 : vector<8x32xf32>
    %191 = arith.mulf %190, %190 : vector<8x32xf32>
    %cst_72 = arith.constant dense<0.000000e+00> : vector<8xf32>
    %192 = vector.multi_reduction <add>, %191, %cst_72 [1] : vector<8x32xf32> to vector<8xf32>
    %193 = vector.shape_cast %192 : vector<8xf32> to vector<8x1xf32>
    %cst_73 = arith.constant 0.0322580636 : f32
    %194 = vector.broadcast %cst_73 : f32 to vector<8x1xf32>
    %195 = arith.mulf %193, %194 : vector<8x1xf32>
    %196 = vector.broadcast %188 : vector<8x1xf32> to vector<8x32xf32>
    %197 = arith.subf %182, %196 : vector<8x32xf32>
    %198 = vector.broadcast %183 : vector<1x32xf32> to vector<8x32xf32>
    %199 = arith.mulf %198, %197 : vector<8x32xf32>
    %200 = math.sqrt %195 : vector<8x1xf32>
    %cst_74 = arith.constant 9.99999997E-7 : f32
    %201 = vector.broadcast %cst_74 : f32 to vector<8x1xf32>
    %202 = arith.addf %200, %201 : vector<8x1xf32>
    %203 = vector.broadcast %202 : vector<8x1xf32> to vector<8x32xf32>
    %204 = arith.divf %199, %203 : vector<8x32xf32>
    %205 = vector.broadcast %184 : vector<1x32xf32> to vector<8x32xf32>
    %206 = arith.addf %204, %205 : vector<8x32xf32>
    %207 = arith.truncf %206 : vector<8x32xf32> to vector<8x32xbf16>
    %cst_75 = arith.constant 0.000000e+00 : f32
    %208 = vector.broadcast %cst_75 : f32 to vector<8x32xf32>
    %c0_76 = arith.constant 0 : index
    %c0_77 = arith.constant 0 : index
    %209 = vector.load %arg16[%c0_76, %c0_77] : memref<32x64xbf16, #tpu.memory_space<vmem>>, vector<32x64xbf16>
    %cst_78 = arith.constant dense<0.000000e+00> : vector<8x64xf32>
    %210 = tpu.matmul %207, %209, %cst_78 {dimension_numbers = #tpu.dot_dimension_numbers<[1], [0], [0], [1], [0, 0, 1, 1], [], []>} : vector<8x32xbf16>, vector<32x64xbf16>, vector<8x64xf32> -> vector<8x64xf32>
    %c0_79 = arith.constant 0 : index
    %c0_80 = arith.constant 0 : index
    %211 = vector.load %arg17[%c0_79, %c0_80] : memref<1x64xf32, #tpu.memory_space<vmem>>, vector<1x64xf32>
    %212 = vector.broadcast %211 : vector<1x64xf32> to vector<8x64xf32>
    %213 = arith.addf %210, %212 : vector<8x64xf32>
    %cst_81 = arith.constant 0.000000e+00 : f32
    %214 = vector.broadcast %cst_81 : f32 to vector<8x64xf32>
    %215 = arith.maximumf %213, %214 : vector<8x64xf32>
    %216 = arith.truncf %215 : vector<8x64xf32> to vector<8x64xbf16>
    %c0_82 = arith.constant 0 : index
    %c0_83 = arith.constant 0 : index
    %217 = vector.load %arg18[%c0_82, %c0_83] : memref<64x32xbf16, #tpu.memory_space<vmem>>, vector<64x32xbf16>
    %cst_84 = arith.constant dense<0.000000e+00> : vector<8x32xf32>
    %218 = tpu.matmul %216, %217, %cst_84 {dimension_numbers = #tpu.dot_dimension_numbers<[1], [0], [0], [1], [0, 0, 1, 1], [], []>} : vector<8x64xbf16>, vector<64x32xbf16>, vector<8x32xf32> -> vector<8x32xf32>
    %219 = arith.addf %208, %218 : vector<8x32xf32>
    %220 = arith.addf %182, %219 : vector<8x32xf32>
    %c0_85 = arith.constant 0 : index
    %c0_86 = arith.constant 0 : index
    %221 = vector.load %arg19[%c0_85, %c0_86] : memref<1x32xf32, #tpu.memory_space<vmem>>, vector<1x32xf32>
    %222 = vector.broadcast %221 : vector<1x32xf32> to vector<8x32xf32>
    %223 = arith.addf %220, %222 : vector<8x32xf32>
    %c0_87 = arith.constant 0 : index
    %c0_88 = arith.constant 0 : index
    %c0_89 = arith.constant 0 : index
    %224 = vector.load %arg20[%c0_87, %c0_88, %c0_89] : memref<1x8x32xf32, #tpu.memory_space<vmem>>, vector<1x8x32xf32>
    %225 = vector.shape_cast %224 : vector<1x8x32xf32> to vector<8x32xf32>
    %226 = vector.shape_cast %223 : vector<8x32xf32> to vector<1x8x32xf32>
    tpu.vector_store %arg20[%c0_87, %c0_88, %c0_89], %226 {strides = array<i32>} : memref<1x8x32xf32, #tpu.memory_space<vmem>>, vector<1x8x32xf32>,
    return
  }
  func.func @transform_0(%arg0: i32, %arg1: i32) -> (i32, i32, i32) {
    %c0_i32 = arith.constant 0 : i32
    %c0_i32_0 = arith.constant 0 : i32
    %c0_i32_1 = arith.constant 0 : i32
    return %arg0, %c0_i32, %c0_i32_0 : i32, i32, i32
  }
  func.func @transform_1(%arg0: i32, %arg1: i32) -> (i32, i32, i32) {
    %c0_i32 = arith.constant 0 : i32
    %c0_i32_0 = arith.constant 0 : i32
    %c0_i32_1 = arith.constant 0 : i32
    return %arg0, %c0_i32, %c0_i32_0 : i32, i32, i32
  }
  func.func @transform_2(%arg0: i32, %arg1: i32) -> (i32, i32) {
    %c0_i32 = arith.constant 0 : i32
    %c0_i32_0 = arith.constant 0 : i32
    %c0_i32_1 = arith.constant 0 : i32
    return %c0_i32, %c0_i32_0 : i32, i32
  }
  func.func @transform_3(%arg0: i32, %arg1: i32) -> (i32, i32) {
    %c0_i32 = arith.constant 0 : i32
    %c0_i32_0 = arith.constant 0 : i32
    %c0_i32_1 = arith.constant 0 : i32
    return %c0_i32, %c0_i32_0 : i32, i32
  }
  func.func @transform_4(%arg0: i32, %arg1: i32) -> (i32, i32) {
    %c0_i32 = arith.constant 0 : i32
    %c0_i32_0 = arith.constant 0 : i32
    %c0_i32_1 = arith.constant 0 : i32
    return %c0_i32, %c0_i32_0 : i32, i32
  }
  func.func @transform_5(%arg0: i32, %arg1: i32) -> (i32, i32) {
    %c0_i32 = arith.constant 0 : i32
    %c0_i32_0 = arith.constant 0 : i32
    %c0_i32_1 = arith.constant 0 : i32
    return %c0_i32, %c0_i32_0 : i32, i32
  }
  func.func @transform_6(%arg0: i32, %arg1: i32) -> (i32, i32) {
    %c0_i32 = arith.constant 0 : i32
    %c0_i32_0 = arith.constant 0 : i32
    %c0_i32_1 = arith.constant 0 : i32
    return %c0_i32, %c0_i32_0 : i32, i32
  }
  func.func @transform_7(%arg0: i32, %arg1: i32) -> (i32, i32) {
    %c0_i32 = arith.constant 0 : i32
    %c0_i32_0 = arith.constant 0 : i32
    %c0_i32_1 = arith.constant 0 : i32
    return %c0_i32, %c0_i32_0 : i32, i32
  }
  func.func @transform_8(%arg0: i32, %arg1: i32) -> (i32, i32) {
    %c0_i32 = arith.constant 0 : i32
    %c0_i32_0 = arith.constant 0 : i32
    %c0_i32_1 = arith.constant 0 : i32
    return %c0_i32, %c0_i32_0 : i32, i32
  }
  func.func @transform_9(%arg0: i32, %arg1: i32) -> (i32, i32) {
    %c0_i32 = arith.constant 0 : i32
    %c0_i32_0 = arith.constant 0 : i32
    %c0_i32_1 = arith.constant 0 : i32
    return %c0_i32, %c0_i32_0 : i32, i32
  }
  func.func @transform_10(%arg0: i32, %arg1: i32) -> (i32, i32) {
    %c0_i32 = arith.constant 0 : i32
    %c0_i32_0 = arith.constant 0 : i32
    %c0_i32_1 = arith.constant 0 : i32
    return %c0_i32, %c0_i32_0 : i32, i32
  }
  func.func @transform_11(%arg0: i32, %arg1: i32) -> (i32, i32) {
    %c0_i32 = arith.constant 0 : i32
    %c0_i32_0 = arith.constant 0 : i32
    %c0_i32_1 = arith.constant 0 : i32
    return %c0_i32, %c0_i32_0 : i32, i32
  }
  func.func @transform_12(%arg0: i32, %arg1: i32) -> (i32, i32) {
    %c0_i32 = arith.constant 0 : i32
    %c0_i32_0 = arith.constant 0 : i32
    %c0_i32_1 = arith.constant 0 : i32
    return %c0_i32, %c0_i32_0 : i32, i32
  }
  func.func @transform_13(%arg0: i32, %arg1: i32) -> (i32, i32) {
    %c0_i32 = arith.constant 0 : i32
    %c0_i32_0 = arith.constant 0 : i32
    %c0_i32_1 = arith.constant 0 : i32
    return %c0_i32, %c0_i32_0 : i32, i32
  }
  func.func @transform_14(%arg0: i32, %arg1: i32) -> (i32, i32) {
    %c0_i32 = arith.constant 0 : i32
    %c0_i32_0 = arith.constant 0 : i32
    %c0_i32_1 = arith.constant 0 : i32
    return %c0_i32, %c0_i32_0 : i32, i32
  }
  func.func @transform_15(%arg0: i32, %arg1: i32) -> (i32, i32) {
    %c0_i32 = arith.constant 0 : i32
    %c0_i32_0 = arith.constant 0 : i32
    %c0_i32_1 = arith.constant 0 : i32
    return %c0_i32, %c0_i32_0 : i32, i32
  }
  func.func @transform_16(%arg0: i32, %arg1: i32) -> (i32, i32) {
    %c0_i32 = arith.constant 0 : i32
    %c0_i32_0 = arith.constant 0 : i32
    %c0_i32_1 = arith.constant 0 : i32
    return %c0_i32, %c0_i32_0 : i32, i32
  }
  func.func @transform_17(%arg0: i32, %arg1: i32) -> (i32, i32) {
    %c0_i32 = arith.constant 0 : i32
    %c0_i32_0 = arith.constant 0 : i32
    %c0_i32_1 = arith.constant 0 : i32
    return %c0_i32, %c0_i32_0 : i32, i32
  }
  func.func @transform_18(%arg0: i32, %arg1: i32) -> (i32, i32, i32) {
    %c0_i32 = arith.constant 0 : i32
    %c0_i32_0 = arith.constant 0 : i32
    return %arg0, %arg1, %c0_i32 : i32, i32, i32
  }
}

</mosaic_0001>

<bundles_post_ra>
// kernel: tpu_custom_call.1
= control target key start
LH: loop header
LB: loop body
LE: loop exit
PB: predicated region body
PF: predicated region fallthrough
CT: control target
= control target key end

     0   :  { %s3100_s0 = inlined_call_operand.vmem [shape: f32[2,8,32], index: 0, kind: input, shape index: {}]   ;;  %s3101_s1 = inlined_call_operand.hbm [shape: f32[2,1,8], index: 1, kind: input, shape index: {}]   ;;  %s3102_s2 = inlined_call_operand.hbm [shape: f32[1,32], index: 2, kind: input, shape index: {}]   ;;  %s3103_s3 = inlined_call_operand.hbm [shape: f32[1,32], index: 3, kind: input, shape index: {}]   ;;  %s3104_s4 = inlined_call_operand.vmem [shape: bf16[32,32], index: 4, kind: input, shape index: {}]   ;;  %s3105_s5 = inlined_call_operand.hbm [shape: f32[1,32], index: 5, kind: input, shape index: {}]   ;;  %s3106_s6 = inlined_call_operand.vmem [shape: bf16[32,32], index: 6, kind: input, shape index: {}]   ;;  %s3107_s7 = inlined_call_operand.hbm [shape: f32[1,32], index: 7, kind: input, shape index: {}]   ;;  %s3108_s8 = inlined_call_operand.hbm [shape: bf16[32,32], index: 8, kind: input, shape index: {}]   ;;  %s3109_s9 = inlined_call_operand.hbm [shape: f32[1,32], index: 9, kind: input, shape index: {}]   ;;  %s3110_s10 = inlined_call_operand.vmem [shape: bf16[32,32], index: 10, kind: input, shape index: {}]   ;;  %s3111_s11 = inlined_call_operand.vmem [shape: f32[1,32], index: 11, kind: input, shape index: {}]   ;;  %s3112_s12 = inlined_call_operand.vmem [shape: f32[1,32], index: 12, kind: input, shape index: {}]   ;;  %s3113_s13 = inlined_call_operand.vmem [shape: f32[1,32], index: 13, kind: input, shape index: {}]   ;;  %s3114_s14 = inlined_call_operand.hbm [shape: bf16[32,64], index: 14, kind: input, shape index: {}]   ;;  %s3115_s15 = inlined_call_operand.vmem [shape: f32[1,64], index: 15, kind: input, shape index: {}]   ;;  %s3116_s16 = inlined_call_operand.vmem [shape: bf16[64,32], index: 16, kind: input, shape index: {}]   ;;  %s3117_s17 = inlined_call_operand.vmem [shape: f32[1,32], index: 17, kind: input, shape index: {}]   ;;  %s3118_s18 = inlined_call_operand.hbm [shape: f32[2,8,32], index: 18, kind: output, shape index: {}]  }
   0x1   :  { %3126 = sst [smem:[#allocation24_spill]] %s3100_s0 }
   0x2   :  { %3127 = sst [smem:[#allocation25_spill]] %s3101_s1 }
   0x3   :  { %3128 = sst [smem:[#allocation26_spill]] %s3102_s2 }
   0x4   :  { %3129 = sst [smem:[#allocation27_spill]] %s3103_s3 }
   0x5   :  { %3130 = sst [smem:[#allocation28_spill]] %s3105_s5 }
   0x6   :  { %3131 = sst [smem:[#allocation29_spill]] %s3107_s7 }
   0x7   :  { %3132 = sst [smem:[#allocation30_spill]] %s3108_s8 }
   0x8   :  { %3133 = sst [smem:[#allocation31_spill]] %s3109_s9 }
   0x9   :  { %3134 = sst [smem:[#allocation32_spill]] %s3112_s12 }
   0xa   :  { %3135 = sst [smem:[#allocation33_spill]] %s3113_s13 }
   0xb   :  { %3136 = sst [smem:[#allocation34_spill]] %s3114_s14 }
   0xc   :  { %3137 = sst [smem:[#allocation35_spill]] %s3115_s15 }
   0xd   :  { %3138 = sst [smem:[#allocation36_spill]] %s3117_s17 }
   0xe   :  { %3139 = sst [smem:[#allocation37_spill]] %s3118_s18 }
   0xf   :  { %23 = vsyncpa [#allocation3], 0 }
  0x10   :  { %25 = vsyncpa [#allocation3 + $0x1], 0 }
  0x11   :  { %26 = vsyncpa [#allocation6], 0 }
  0x12   :  { %27 = vsyncpa [#allocation9], 0 }
  0x13   :  { %28 = vsyncpa [#allocation12], 0 }
  0x14   :  { %29 = vsyncpa [#allocation15], 0 }
  0x15   :  { %30 = vsyncpa [#allocation4], 0 }
  0x16   :  { %32 = vsyncpa [#allocation4 + $0x1], 0  ;;  %s2687_s27 = smov 0   ;;  %s2689_s28 = smov 0  }
  0x17   :  { %s2691_s29 = smov 0   ;;  %s2693_s30 = smov 0  }
  0x18   :  { %s2695_s0 = smov 0   ;;  %s2697_s19 = smov 0  }
  0x19 LB: > { %s3119_s1 = sadd.s32 4294967295, %s2570_s19   ;;  %p1876_p0 = scmp.ge.s32.totalorder %s2570_s19, 1  ;;  %s2570_s19 = sphi %s2697_s19, %s38_s19   ;;  %s2566_s0 = sphi %s2695_s0, %s3175_s0   ;;  %s2562_s30 = sphi %s2693_s30, %s3174_s30   ;;  %s2558_s29 = sphi %s2691_s29, %s3173_s29   ;;  %s2554_s28 = sphi %s2689_s28, %s3172_s28   ;;  %s2550_s27 = sphi %s2687_s27, %s3171_s27  }
  0x1a   : > { %p2721_p1 = scmp.eq.s32.totalorder %s3119_s1, 0  ;;  %p471_p2 = scmp.lt.s32.totalorder %s2570_s19, 3 }
  0x1b   : > { %s2572_s22 = smov [#allocation5]   ;;  %s2573_s23 = smov [#allocation8]  }
  0x1c   : > { %s3140_s20 = scalar_select %p2721_p1, 1, 0 }
  0x1d   : > { %p2726_p3 = pnand %p1876_p0, %p471_p2  ;;  %s484_s2 = sshll.u32 %s2572_s22, 4  ;;  %s485_s2 = int_to_ptr.vmem [resolvable:$true] %s484_s2 }
  0x1e   : > { %s509_s24 = sshll.u32 %s2573_s23, 4  ;;  %s2574_s26 = smov [#allocation11]   ;;  %s510_s24 = int_to_ptr.vmem [resolvable:$true] %s509_s24 }
  0x1f   : > { %s3141_s21 = scalar_select %p2726_p3, 1, 0 }
  0x20   : > { %p2106_p5 = pneg %p2726_p3  ;;  %s533_s1 = sshll.u32 %s2574_s26, 4  ;;  %s2739_s1 = int_to_ptr.vmem [resolvable:$true] %s533_s1 }
  0x21   : > { %s2275_s18 = scalar_lea.vmem %s485_s2, 16  ;;  %s2282_s23 = scalar_lea.vmem %s485_s2, 32 }
  0x22   : > { %p2735_p6 = pnand %p2106_p5, %p2721_p1  ;;  %p2276_p8 = scmp.ne.s32.totalorder %s485_s2, %s2275_s18 }
  0x23   : > { %p2283_p11 = scmp.lt.s32.totalorder %s485_s2, %s485_s2  ;;  %p2284_p12 = scmp.lt.s32.totalorder %s2282_s23, %s2275_s18 }
  0x24   : > { %p2743_p7 = pneg %p2735_p6 }
  0x25   : > { %p2285_p13 = por %p2284_p12, %p2283_p11 }
  0x26   : > { %p2278_p9 = pnand %p2276_p8, %p2743_p7 }
  0x28   : > { %p2279_p10 = pneg %p2278_p9 }
  0x2a   : > { %p2286_p0 = pnand %p2285_p13, %p2279_p10 }
  0x2c   : > { %2289 = shalt.err (!%p2286_p0)
}
  0x2d   : > { %s3144_s15 = sld [smem:[#allocation26_spill]]  ;;  %s2301_s13 = scalar_lea.vmem %s510_s24, 16 }
  0x2e   : > { %p2302_p2 = scmp.ne.s32.totalorder %s510_s24, %s2301_s13  ;;  %s2308_s12 = scalar_lea.vmem %s510_s24, 32 }
  0x2f   : > { %p2309_p8 = scmp.lt.s32.totalorder %s510_s24, %s510_s24  ;;  %p2310_p9 = scmp.lt.s32.totalorder %s2308_s12, %s2301_s13 }
  0x30   : > { %p2304_p5 = pnand %p2302_p2, %p2743_p7 }
  0x31   : > { %p2311_p3 = por %p2310_p9, %p2309_p8 }
  0x32   : > { %p2305_p4 = pneg %p2304_p5 }
  0x33   : > { %2109 = dma.hbm_to_vmem [thread:$0]  (!%p2735_p6), %s3144_s15, 16, %s485_s2, [#allocation6]  }
  0x34   : > { %p2312_p1 = pnand %p2311_p3, %p2305_p4 }
  0x36   : > { %2315 = shalt.err (!%p2312_p1)
}
  0x37   : > { %s3145_s5 = sld [smem:[#allocation28_spill]]  ;;  %s2327_s15 = scalar_lea.vmem %s2739_s1, 256 }
  0x38   : > { %p2328_p10 = scmp.ne.s32.totalorder %s2739_s1, %s2327_s15  ;;  %p2335_p13 = scmp.lt.s32.totalorder %s2739_s1, %s2739_s1 }
  0x39   : > { %p2336_p0 = scmp.lt.s32.totalorder %s2327_s15, %s2327_s15 }
  0x3a   : > { %p2330_p11 = pnand %p2328_p10, %p2743_p7 }
  0x3b   : > { %p2337_p3 = por %p2336_p0, %p2335_p13 }
  0x3c   : > { %p2331_p12 = pneg %p2330_p11 }
  0x3d   : > { %2115 = dma.hbm_to_vmem [thread:$0]  (!%p2735_p6), %s3145_s5, 16, %s510_s24, [#allocation9]  }
  0x3e   : > { %p2338_p1 = pnand %p2337_p3, %p2331_p12 }
  0x40   : > { %2341 = shalt.err (!%p2338_p1)
}
  0x41   : > { %s3124_s12 = smov 64   ;;  %s2576_s13 = smov 4  }
  0x42   : > { %s3146_s8 = sld [smem:[#allocation30_spill]]  ;;  %s2577_s24 = smov [#allocation7]  }
  0x43   : > { %s495_s26 = sshll.u32 %s2577_s24, 4  ;;  %s2578_s18 = smov [#allocation10]   ;;  %s496_s26 = int_to_ptr.vmem [resolvable:$true] %s495_s26 }
  0x44   : > { %s523_s23 = sshll.u32 %s2578_s18, 4  ;;  %s2353_s15 = scalar_lea.vmem %s496_s26, 16  ;;  %s524_s23 = int_to_ptr.vmem [resolvable:$true] %s523_s23 }
  0x45   : > { %p2354_p4 = scmp.ne.s32.totalorder %s496_s26, %s2353_s15  ;;  %s2360_s5 = scalar_lea.vmem %s496_s26, 32 }
  0x46   : > { %p2361_p8 = scmp.lt.s32.totalorder %s496_s26, %s496_s26  ;;  %p2362_p9 = scmp.lt.s32.totalorder %s2360_s5, %s2353_s15 }
  0x47   : > { %p2356_p2 = pnand %p2354_p4, %p2743_p7 }
  0x48   : > { %2121 = dma.hbm_to_vmem [thread:$0]  (!%p2735_p6), %s3146_s8, 256, %s2739_s1, [#allocation12], %s3124_s12, %s3124_s12, %s2576_s13  }
  0x49   : > { %p2357_p5 = pneg %p2356_p2  ;;  %p2363_p10 = por %p2362_p9, %p2361_p8 }
  0x4b   : > { %p2364_p11 = pnand %p2363_p10, %p2357_p5 }
  0x4d   : > { %2367 = shalt.err (!%p2364_p11)
}
  0x4e   : > { %s3147_s3 = sld [smem:[#allocation27_spill]]  ;;  %s2379_s2 = scalar_lea.vmem %s524_s23, 16 }
  0x4f   : > { %p2380_p12 = scmp.ne.s32.totalorder %s524_s23, %s2379_s2  ;;  %s2386_s24 = scalar_lea.vmem %s524_s23, 32 }
  0x50   : > { %p2387_p3 = scmp.lt.s32.totalorder %s524_s23, %s524_s23  ;;  %p2388_p1 = scmp.lt.s32.totalorder %s2386_s24, %s2379_s2 }
  0x51   : > { %p2382_p13 = pnand %p2380_p12, %p2743_p7 }
  0x52   : > { %p2389_p4 = por %p2388_p1, %p2387_p3 }
  0x53   : > { %p2383_p0 = pneg %p2382_p13 }
  0x54   : > { %2112 = dma.hbm_to_vmem [thread:$0]  (!%p2735_p6), %s3147_s3, 16, %s496_s26, [#allocation6]  }
  0x55   : > { %p2390_p2 = pnand %p2389_p4, %p2383_p0 }
  0x57   : > { %2393 = shalt.err (!%p2390_p2)
}
  0x58   : > { %s3148_s7 = sld [smem:[#allocation29_spill]]  ;;  %s2579_s26 = smov [#allocation13]  }
  0x59   : > { %s547_s15 = sshll.u32 %s2579_s26, 4  ;;  %s2580_s17 = smov [#allocation14]   ;;  %s548_s15 = int_to_ptr.vmem [resolvable:$true] %s547_s15 }
  0x5a   : > { %s569_s1 = sshll.u32 %s2580_s17, 4  ;;  %s2405_s12 = scalar_lea.vmem %s548_s15, 16  ;;  %s570_s1 = int_to_ptr.vmem [resolvable:$true] %s569_s1 }
  0x5b   : > { %p2406_p5 = scmp.ne.s32.totalorder %s548_s15, %s2405_s12  ;;  %s2412_s2 = scalar_lea.vmem %s548_s15, 32 }
  0x5c   : > { %p2413_p10 = scmp.lt.s32.totalorder %s548_s15, %s548_s15  ;;  %p2414_p11 = scmp.lt.s32.totalorder %s2412_s2, %s2405_s12 }
  0x5d   : > { %p2408_p8 = pnand %p2406_p5, %p2743_p7 }
  0x5e   : > { %2118 = dma.hbm_to_vmem [thread:$0]  (!%p2735_p6), %s3148_s7, 16, %s524_s23, [#allocation9]  }
  0x5f   : > { %p2409_p9 = pneg %p2408_p8  ;;  %p2415_p12 = por %p2414_p11, %p2413_p10 }
  0x61   : > { %p2416_p13 = pnand %p2415_p12, %p2409_p9 }
  0x63   : > { %2419 = shalt.err (!%p2416_p13)
}
  0x64   : > { %s3149_s9 = sld [smem:[#allocation31_spill]]  ;;  %s2431_s5 = scalar_lea.vmem %s570_s1, 256 }
  0x65   : > { %p2432_p0 = scmp.ne.s32.totalorder %s570_s1, %s2431_s5  ;;  %p2439_p4 = scmp.lt.s32.totalorder %s570_s1, %s570_s1 }
  0x66   : > { %p2440_p2 = scmp.lt.s32.totalorder %s2431_s5, %s2431_s5 }
  0x67   : > { %p2434_p3 = pnand %p2432_p0, %p2743_p7 }
  0x68   : > { %p2441_p5 = por %p2440_p2, %p2439_p4 }
  0x69   : > { %p2435_p1 = pneg %p2434_p3 }
  0x6a   : > { %2124 = dma.hbm_to_vmem [thread:$0]  (!%p2735_p6), %s3149_s9, 16, %s548_s15, [#allocation12]  }
  0x6b   : > { %p2442_p8 = pnand %p2441_p5, %p2435_p1 }
  0x6d   : > { %2445 = shalt.err (!%p2442_p8)
}
  0x6e   : > { %s3150_s12 = smov 64   ;;  %s3151_s14 = sld [smem:[#allocation34_spill]] }
  0x6f   : > { %s1875_s25 = sadd.s32 4294967294, %s2570_s19   ;;  %s50_s22 = sadd.s32 1, %s2566_s0 }
  0x70   : > { %s83_s15 = sadd.s32 1, %s2558_s29  ;;  %p52_p7 = scmp.ge.s32.totalorder %s50_s22, 2 }
  0x71   : > { %p90_p9 = scmp.ne.s32.totalorder %s2558_s29, %s2554_s28  ;;  %p91_p10 = scmp.eq.s32.totalorder %s2570_s19, 0 }
  0x72   : > { %p96_p11 = scmp.ne.s32.totalorder %s2554_s28, %s2550_s27  ;;  %s3177_s22 = smov (%p52_p7, %s50_s22), 0 }
  0x73   : > { %3152 = sst [smem:[#allocation23_spill]] %s3177_s22  ;;  %p2817_p12 = por %p91_p10, %p90_p9 }
  0x74   : > { %2127 = dma.hbm_to_vmem [thread:$0]  (!%p2735_p6), %s3151_s14, 256, %s570_s1, [#allocation15], %s3150_s12, %s3150_s12, %s2576_s13  }
  0x75   : > { %p3154_p13 = scmp.ne.s32.totalorder %s3140_s20, 0  ;;  %s80_s1 = ssub.s32 %s2566_s0, %s3177_s22 }
  0x76   : > { %s3156_s2 = sadd.s32 4294967295, %s2570_s19   ;;  %p81_p3 = scmp.eq.s32.totalorder %s80_s1, 0 }
  0x77   : > { %p2823_p6 = por %p3154_p13, %p96_p11  ;;  %p458_p0 = scmp.eq.s32.totalorder %s3156_s2, 1 }
  0x78   : > { %p464_p1 = scmp.eq.s32.totalorder %s1875_s25, 1  ;;  %p2143_p2 = scmp.lt.s32.totalorder %s2570_s19, 2 }
  0x79   : > { %p2831_p4 = por %p458_p0, %p90_p9  ;;  %s599_s12 = sand.u32 1, %s2558_s29  }
  0x7a   : > { %s2837_s23 = scalar_select %p81_p3, %s2558_s29, %s83_s15  }
  0x7b   : > { %p2839_p5 = por %p464_p1, %p96_p11  ;;  %s1885_s18 = sshll.u32 %s2566_s0, 4 }
  0x7c   : > { %s602_s26 = scalar_lea.vmem [#allocation2], %s599_s12  ;;  %s3159_s2 = sld [smem:[#allocation25_spill]] }
  0x7d   : > { %s609_s3 = sshll.u32 %s602_s26, 4  ;;  %p2850_p8 = pnand %p2143_p2, %p2817_p12  ;;  %s610_s3 = int_to_ptr.vmem [resolvable:$true] %s609_s3 }
  0x7e   : > { %s600_s15 = scalar_lea.sflag [#allocation3], %s599_s12  ;;  %s2459_s9 = scalar_lea.vmem %s610_s3, 16 }
  0x7f   : > { %p2448_p7 = pneg %p2850_p8  ;;  %p2460_p9 = scmp.ne.s32.totalorder %s610_s3, %s2459_s9 }
  0x80   : > { %s2581_s14 = smov [#allocation2]  }
  0x81   : > { %p2462_p10 = pnand %p2460_p9, %p2448_p7  ;;  %s2464_s26 = sshll.u32 %s2581_s14, 4  ;;  %s2465_s26 = int_to_ptr.vmem [resolvable:$false] %s2464_s26 }
  0x82   : > { %s607_s1 = scalar_lea.hbm %s3159_s2, %s1885_s18  ;;  %s2466_s22 = scalar_lea.vmem %s2465_s26, 32 }
  0x83   : > { %p2463_p11 = pneg %p2462_p10  ;;  %p2467_p13 = scmp.lt.s32.totalorder %s610_s3, %s2465_s26 }
  0x84   : > { %p2468_p0 = scmp.lt.s32.totalorder %s2466_s22, %s2459_s9 }
  0x86   : > { %p2469_p3 = por %p2468_p0, %p2467_p13 }
  0x88   : > { %p2470_p1 = pnand %p2469_p3, %p2463_p11 }
  0x8a   : > { %2473 = shalt.err (!%p2470_p1)
}
  0x8b   : > { %2131 = dma.hbm_to_vmem [thread:$0]  (!%p2850_p8), %s607_s1, 16, %s610_s3, %s600_s15  }
  0x8c   : > { %p3161_p12 = scmp.ne.s32.totalorder %s3141_s21, 0 }
  0x8d   : > { %s2861_s7 = sand.u32 (!%p3161_p12), 1, %s2554_s28  }
  0x8e   : > { %618 = sbr.rel (%p3161_p12) target bundleno = 2433 (0x981), region = 92  ;;  %s621_s8 = scalar_lea.sflag (!%p3161_p12), [#allocation3], %s2861_s7 }
  0x8f   : > { %s623_s14 = scalar_lea.vmem (!%p3161_p12), [#allocation2], %s2861_s7 }
  0x93   : > { %2525 = dma.done.wait (%p2823_p6), %s621_s8, 16  }
  0x94   : > { %2527 = vsyncadd (%p2823_p6), %s621_s8, 4294967280  ;;  %p3162_p2 = scmp.ne.s32.totalorder %s3140_s20, 0 }
  0x96   : > { %2529 = dma.done.wait (%p3162_p2), [#allocation6], 32  }
  0x97   : > { %2531 = vsyncadd (%p3162_p2), [#allocation6], 4294967264 }
  0x98   : > { %2533 = dma.done.wait (%p3162_p2), [#allocation9], 32  }
  0x99   : > { %2535 = vsyncadd (%p3162_p2), [#allocation9], 4294967264 }
  0x9a   : > { %2537 = dma.done.wait (%p3162_p2), [#allocation12], 272  }
  0x9b   : > { %2539 = vsyncadd (%p3162_p2), [#allocation12], 4294967024 }
  0x9c   : > { %2541 = dma.done.wait (%p3162_p2), [#allocation15], 256  }
  0x9d   : > { %2543 = vsyncadd (%p3162_p2), [#allocation15], 4294967040  ;;  %p707_p6 = scmp.lt.s32.totalorder %s2562_s30, 1  ;;  %s3163_s17 = sld [smem:[#allocation24_spill]]  ;;  %vm715_vm0 = vcmask 261120   ;;  %v2218_v7 = vld [vmem:[%s3106_s6 + $0x8] sm:$0xff]   ;;  %v952_v62 = vlaneseq }
  0x9e   : > { %v2219_v8 = vld [vmem:[#allocation11 + $0x8] sm:$0xff]   ;;  %v2582_v9 = vmov 0.0   ;;  %v2220_v10 = vld [vmem:[%s3106_s6] sm:$0xff]   ;;  %v2221_v11 = vld [vmem:[#allocation11] sm:$0xff]   ;;  %vm2583_vm1 = vmmov 0   ;;  %vm957_vm4 = vcmask 64512  }
  0x9f   : > { %s708_s3 = scalar_select %p707_p6, %s2562_s30, 1  ;;  %1974 = vmatprep.subr.bf16.mxu0 %v2582_v9  ;;  %1982 = vmatprep.subr.bf16.mxu1 %v2582_v9  ;;  %v1896_v20 = vld [vmem:[#allocation5] ss:$0 sm:$0xff]  ;;  %v1897_v23 = vld [vmem:[#allocation7] ss:$0 sm:$0xff]  ;;  %v2222_v26 = vld [vmem:[%s3104_s4 + $0x8] sm:$0xff]  }
  0xa0   : > { %1975 = vmatpush3.bf16.msra.mxu0 %v2218_v7  ;;  %1983 = vmatpush3.bf16.msra.mxu1 %v2219_v8  ;;  %v2223_v28 = vld [vmem:[%s3104_s4] sm:$0xff]   ;;  %v1898_v29 = vld [vmem:[#allocation10] ss:$0 sm:$0xff]  ;;  %v1902_v30 = vld [vmem:[#allocation13] ss:$0 sm:$0xff]  ;;  %vm1023_vm5 = vcmask 1043456  }
  0xa1   : > { %s1895_s9 = sshll.u32 %s708_s3, 3  ;;  %1976 = vmatprep.subr.bf16.mxu0 %v2582_v9  ;;  %1984 = vmatprep.subr.bf16.mxu1 %v2582_v9  ;;  %s2584_s8 = smov 112   ;;  %v1906_v45 = vld [vmem:[#allocation8] ss:$0 sm:$0xff]  ;;  %v948_v63 = vld [vmem:[%s623_s14] sm:$0x1] }
  0xa2   : > { %1978 = vmatprep.mubr.msk.bf16.mxu0 %vm2583_vm1, %v2582_v9  ;;  %1986 = vmatprep.mubr.msk.bf16.mxu1 %vm2583_vm1, %v2582_v9  ;;  %s2585_s3 = smov 120   ;;  %vm949_vm6 = vcmp.ne.f32.partialorder %v948_v63, 0.0  ;;  %s2589_s20 = smov 16   ;;  %vm1440_vm7 = vcmask 130048   ;;  %vm1443_vm8 = vcmask 195584   ;;  %vm1650_vm11 = vcmask 523264  }
  0xa3   : > { %s710_s13 = scalar_lea.vmem %s3163_s17, %s1895_s9  ;;  %s2586_s9 = smov 104  }
  0xa4   : > { %v2890_v0 = vld [vmem:[%s710_s13] sm:$0xff]  ;;  %1977 = vmatpush3.bf16.msra.mxu0 %v2220_v10  ;;  %1985 = vmatpush3.bf16.msra.mxu1 %v2221_v11  ;;  %s2588_s13 = smov 8   ;;  %s2590_s12 = smov 24  }
  0xa5   : > { %v716_v1 = vsel %vm715_vm0, %v2890_v0, 0.0  ;;  %1990 = vmatprep.subr.bf16.mxu0 %v2582_v9  ;;  %1998 = vmatprep.subr.bf16.mxu1 %v2582_v9  ;;  %s3165_s22 = sld [smem:[#allocation33_spill]]  ;;  %s1894_s25 = sshll.u32 %s2861_s7, 3 }
  0xa6   : > { %717 = vadd.xlane.f32.xlu0 %v716_v1  ;;  %v953_v1 = vshrl.u32 %v952_v62, 7  ;;  %s3166_s1 = sld [smem:[#allocation35_spill]] }
  0xa7   : > { %s3168_s17 = sld [smem:[#allocation37_spill]] }
 0x12f   : > { %v718_v2 = vpop.xlane.xlu0 %717 }
 0x130   : > { %v720_v3 = vmul.f32 0.03125, %v718_v2  ;;  %v954_v2 = vsub.s32 0, %v953_v1 }
 0x132   : > { %v721_v4 = vsub.f32 %v2890_v0, %v720_v3  ;;  %v2587_v3 = vmov -1e+09  }
 0x134   : > { %v722_v5 = vmul.f32 %v721_v4, %v721_v4  ;;  %v733_v21 = vmul.f32 %v1896_v20, %v721_v4  ;;  %v950_v4 = vsel %vm949_vm6, 0.0, %v2587_v3 }
 0x136   : > { %v723_v6 = vsel %vm715_vm0, %v722_v5, 0.0  ;;  %v955_v5 = vrot.slane %v950_v4, %v954_v2 }
 0x137   : > { %724 = vadd.xlane.f32.xlu0 %v723_v6 }
 0x1c0   : > { %v725_v12 = vpop.xlane.xlu0 %724 }
 0x1c1   : > { %v726_v13 = vmul.f32 0.032258064, %v725_v12 }
 0x1c3   : > { %2232 = vrsqrt.f32 %v726_v13  ;;  %vm736_vm2 = vcmp.eq.f32.partialorder %v726_v13, inf  ;;  %v739_v16 = vand.u32 2147483648, %v726_v13  ;;  %vm738_vm3 = vcmp.eq.f32.partialorder %v726_v13, 0.0 }
 0x1d0   : > { %v2233_v14 = vpop.eup %2232 }
 0x1d1   : > { %v735_v15 = vmul.f32 %v2233_v14, %v726_v13 }
 0x1d3   : > { %v737_v17 = vsel %vm736_vm2, %v726_v13, %v735_v15 }
 0x1d4   : > { %v740_v18 = vsel %vm738_vm3, %v739_v16, %v737_v17 }
 0x1d5   : > { %v741_v19 = vadd.f32 1e-06, %v740_v18 }
 0x1d7   : > { %2234 = vrcp.f32 %v741_v19 }
 0x1e4   : > { %v2235_v22 = vpop.eup %2234 }
 0x1e5   : > { %v743_v24 = vmul.f32 %v2235_v22, %v733_v21 }
 0x1e7   : > { %v750_v25 = vadd.f32 %v1897_v23, %v743_v24 }
 0x1e9   : > { %v751_v27 = vpack.c.bf16 %v750_v25, %v750_v25 }
 0x1eb   : > { %1979 = vmatmul.mubr.msk.bf16.vlgmr.msra.gmra.mxu0 %vm715_vm0, %v751_v27  ;;  %1987 = vmatmul.mubr.msk.bf16.vlgmr.msra.gmra.mxu1 %vm715_vm0, %v751_v27 }
 0x1ec   : > { %1991 = vmatpush3.bf16.msra.mxu0 %v2222_v26  ;;  %1994 = vmatprep.mubr.msk.bf16.mxu0 %vm2583_vm1, %v2582_v9 }
 0x1ed   : > { %1992 = vmatprep.subr.bf16.mxu0 %v2582_v9  ;;  %2000 = vmatprep.mubr.msk.bf16.mxu1 %vm2583_vm1, %v2582_v9 }
 0x1f0   : > { %1993 = vmatpush3.bf16.msra.mxu0 %v2223_v28 }
 0x1f1   : > { %2004 = vmatprep.subr.bf16.mxu0 %v2582_v9 }
 0x1f3   : > { %1995 = vmatmul.mubr.msk.bf16.vlgmr.msra.gmra.mxu0 %vm715_vm0, %v751_v27 }
 0x1f4   : > { %2006 = vmatprep.mubr.msk.bf16.mxu0 %vm2583_vm1, %v2582_v9 }
 0x2ab   : > { %v812_v31 = vpop.f32.mrf.mxu0  ;;  %v876_v32 = vpop.f32.mrf.mxu1 }
 0x2ac   : > { %v813_v33 = vadd.f32 %v1898_v29, %v812_v31  ;;  %v877_v34 = vadd.f32 %v1902_v30, %v876_v32 }
 0x2ad   : > { %v1980_v35 = vpop.f32.mrf.mxu0  ;;  %v1988_v36 = vpop.f32.mrf.mxu1 }
 0x2ae   : > { %v818_v37 = vpack.c.bf16 %v813_v33, %v813_v33  ;;  %v2929_v38 = vpack.c.bf16 %v877_v34, %v877_v34 }
 0x2af   : > { %v815_v39 = vpop.f32.mrf.mxu0  ;;  %v879_v40 = vpop.f32.mrf.mxu1 }
 0x2b0   : > { %1194 = vrot.lane.b32.xlu0 %v818_v37, %s2584_s8  ;;  %1075 = vrot.lane.b32.xlu1 %v818_v37, %s2585_s3  ;;  %v962_v41 = vsel %vm957_vm4, %v818_v37, 0  ;;  %v1025_v42 = vsel %vm1023_vm5, %v2929_v38, 0 }
 0x2b1   : > { %v1981_v43 = vpop.f32.mrf.mxu0  ;;  %v1989_v44 = vpop.f32.mrf.mxu1  ;;  %1999 = vmatpush3.bf16.xpose.msra.mxu1 %v962_v41  ;;  %2005 = vmatpush3.bf16.msra.mxu0 %v1025_v42 }
 0x2b2   : > { %2010 = vmatprep.subr.bf16.mxu1 %v2582_v9  ;;  %2016 = vmatprep.subr.bf16.mxu0 %v2582_v9 }
 0x2b3   : > { %v940_v46 = vpop.f32.mrf.mxu0 }
 0x2b4   : > { %v941_v47 = vadd.f32 %v1906_v45, %v940_v46 }
 0x2b5   : > { %v1996_v48 = vpop.f32.mrf.mxu0 }
 0x2b6   : > { %v946_v49 = vmul.f32 0.35355338, %v941_v47 }
 0x2b7   : > { %v943_v50 = vpop.f32.mrf.mxu0 }
 0x2b8   : > { %v947_v51 = vpack.c.bf16 %v946_v49, %v946_v49 }
 0x2b9   : > { %v1997_v52 = vpop.f32.mrf.mxu0 }
 0x2ba   : > { %1072 = vrot.lane.b32.xlu1 %v947_v51, %s2585_s3  ;;  %2001 = vmatmul.mubr.msk.bf16.vlgmr.msra.gmra.mxu1 %vm957_vm4, %v947_v51 }
 0x2bb   : > { %2012 = vmatprep.mubr.msk.bf16.mxu1 %vm2583_vm1, %v2582_v9 }
 0x2be   : > { %1192 = vrot.lane.b32.xlu1 %v947_v51, %s2584_s8 }
 0x2c2   : > { %1312 = vrot.lane.b32.xlu1 %v818_v37, %s2586_s9 }
 0x2c6   : > { %1310 = vrot.lane.b32.xlu1 %v947_v51, %s2586_s9 }
 0x322   : > { %v1076_v53 = vpop.permute.xlu1 %1075  ;;  %v1195_v55 = vpop.permute.xlu0 %1194 }
 0x323   : > { %v1081_v54 = vsel %vm957_vm4, %v1076_v53, 0  ;;  %v1200_v57 = vsel %vm957_vm4, %v1195_v55, 0 }
 0x324   : > { %2011 = vmatpush3.bf16.xpose.msra.mxu1 %v1081_v54 }
 0x325   : > { %2022 = vmatprep.subr.bf16.mxu1 %v2582_v9 }
 0x32c   : > { %v1073_v56 = vpop.permute.xlu1 %1072 }
 0x32d   : > { %2013 = vmatmul.mubr.msk.bf16.vlgmr.msra.gmra.mxu1 %vm957_vm4, %v1073_v56 }
 0x32e   : > { %2023 = vmatpush3.bf16.xpose.msra.mxu1 %v1200_v57  ;;  %2024 = vmatprep.mubr.msk.bf16.mxu1 %vm2583_vm1, %v2582_v9 }
 0x32f   : > { %2034 = vmatprep.subr.bf16.mxu1 %v2582_v9 }
 0x330   : > { %v1193_v58 = vpop.permute.xlu1 %1192 }
 0x334   : > { %v1313_v59 = vpop.permute.xlu1 %1312 }
 0x335   : > { %v1318_v60 = vsel %vm957_vm4, %v1313_v59, 0  ;;  %2025 = vmatmul.mubr.msk.bf16.vlgmr.msra.gmra.mxu1 %vm957_vm4, %v1193_v58 }
 0x336   : > { %2035 = vmatpush3.bf16.xpose.msra.mxu1 %v1318_v60  ;;  %2036 = vmatprep.mubr.msk.bf16.mxu1 %vm2583_vm1, %v2582_v9 }
 0x337   : > { %2046 = vmatprep.subr.bf16.mxu1 %v2582_v9 }
 0x338   : > { %v1311_v61 = vpop.permute.xlu1 %1310 }
 0x33d   : > { %2037 = vmatmul.mubr.msk.bf16.vlgmr.msra.gmra.mxu1 %vm957_vm4, %v1311_v61 }
 0x33e   : > { %2050 = vmatprep.mubr.msk.bf16.mxu1 %vm2583_vm1, %v2582_v9 }
 0x37a   : > { %v998_v6 = vpop.f32.mrf.mxu1 }
 0x37b   : > { %v999_v7 = vadd.f32 %v998_v6, %v955_v5 }
 0x37c   : > { %v2002_v8 = vpop.f32.mrf.mxu1 }
 0x37d   : > { %v1004_v10 = vsel %vm957_vm4, %v999_v7, -inf }
 0x37e   : > { %1005 = vmax.xlane.f32.xlu1 %v1004_v10  ;;  %v1001_v11 = vpop.f32.mrf.mxu1 }
 0x380   : > { %v2003_v12 = vpop.f32.mrf.mxu1 }
 0x38f   : > { %1258 = vrot.lane.b32.xlu1 %v2929_v38, %s2584_s8  ;;  %s3167_s8 = sld [smem:[#allocation36_spill]] }
 0x3ed   : > { %v1117_v13 = vpop.f32.mrf.mxu1 }
 0x3ee   : > { %v1118_v14 = vadd.f32 %v1117_v13, %v955_v5 }
 0x3ef   : > { %v2014_v15 = vpop.f32.mrf.mxu1 }
 0x3f0   : > { %v1123_v16 = vsel %vm957_vm4, %v1118_v14, -inf }
 0x3f1   : > { %1124 = vmax.xlane.f32.xlu0 %v1123_v16  ;;  %v1120_v17 = vpop.f32.mrf.mxu1 }
 0x3f3   : > { %v2015_v18 = vpop.f32.mrf.mxu1 }
 0x3f5   : > { %v1236_v19 = vpop.f32.mrf.mxu1 }
 0x3f6   : > { %v1237_v20 = vadd.f32 %v1236_v19, %v955_v5 }
 0x3f7   : > { %v2026_v21 = vpop.f32.mrf.mxu1 }
 0x3f8   : > { %v1242_v22 = vsel %vm957_vm4, %v1237_v20, -inf }
 0x3f9   : > { %1243 = vmax.xlane.f32.xlu1 %v1242_v22  ;;  %v1239_v23 = vpop.f32.mrf.mxu1 }
 0x3fb   : > { %v2027_v24 = vpop.f32.mrf.mxu1 }
 0x3fd   : > { %v1354_v25 = vpop.f32.mrf.mxu1 }
 0x3fe   : > { %v1355_v26 = vadd.f32 %v1354_v25, %v955_v5 }
 0x3ff   : > { %v2038_v27 = vpop.f32.mrf.mxu1 }
 0x400   : > { %v1360_v28 = vsel %vm957_vm4, %v1355_v26, -inf }
 0x401   : > { %1361 = vmax.xlane.f32.xlu1 %v1360_v28  ;;  %v1357_v29 = vpop.f32.mrf.mxu1 }
 0x403   : > { %v2039_v30 = vpop.f32.mrf.mxu1 }
 0x407   : > { %v1006_v31 = vpop.xlane.xlu1 %1005  ;;  %1140 = vrot.lane.b32.xlu0 %v2929_v38, %s2585_s3  ;;  %s1935_s3 = sshll.u32 %s2562_s30, 7  ;;  %s1705_s30 = scalar_lea.sflag [#allocation4], %s2861_s7 }
 0x408   : > { %v1007_v32 = vmax.f32 %v1006_v31, -1e+30 }
 0x40a   : > { %v1011_v33 = vsub.f32 %v999_v7, %v1007_v32  ;;  %v1008_v2 = vsub.f32 -1e+30, %v1007_v32 }
 0x40b   : > { %v1259_v41 = vpop.permute.xlu1 %1258 }
 0x40c   : > { %v1012_v34 = vmul.f32 1.442695, %v1011_v33  ;;  %v1264_v55 = vsel %vm1023_vm5, %v1259_v41, 0  ;;  %v1009_v3 = vmul.f32 1.442695, %v1008_v2 }
 0x40e   : > { %2236 = vpow2.f32 %v1012_v34 }
 0x412   : > { %1376 = vrot.lane.b32.xlu1 %v2929_v38, %s2586_s9  ;;  %s3164_s9 = sld [smem:[#allocation32_spill]] }
 0x41b   : > { %v2237_v35 = vpop.eup %2236 }
 0x41c   : > { %v1019_v36 = vpack.c.bf16 %v2237_v35, %v2237_v35  ;;  %v1015_v1 = vsel %vm957_vm4, %v2237_v35, 0.0 }
 0x41e   : > { %2007 = vmatmul.mubr.msk.bf16.vlgmr.msra.gmra.mxu0 %vm957_vm4, %v1019_v36 }
 0x41f   : > { %2018 = vmatprep.mubr.msk.bf16.mxu0 %vm2583_vm1, %v2582_v9 }
 0x47a   : > { %v1125_v37 = vpop.xlane.xlu0 %1124 }
 0x47b   : > { %v1126_v39 = vmax.f32 %v1125_v37, -1e+30 }
 0x47d   : > { %v1130_v40 = vsub.f32 %v1118_v14, %v1126_v39  ;;  %v1127_v13 = vsub.f32 -1e+30, %v1126_v39  ;;  %v2224_v39 = vld [vmem:[%s3110_s10 + $0x8] sm:$0xff]  }
 0x47e   : > { %v1141_v42 = vpop.permute.xlu0 %1140  ;;  %2047 = vmatpush3.bf16.msra.mxu1 %v2224_v39  ;;  %v1924_v39 = vld [vmem:[%s3166_s1] ss:$0 sm:$0xff] }
 0x47f   : > { %v1131_v43 = vmul.f32 1.442695, %v1130_v40  ;;  %v1146_v44 = vsel %vm1023_vm5, %v1141_v42, 0  ;;  %v1128_v15 = vmul.f32 1.442695, %v1127_v13  ;;  %v2225_v42 = vld [vmem:[%s3110_s10] sm:$0xff]   ;;  %2048 = vmatprep.subr.bf16.mxu1 %v2582_v9 }
 0x480   : > { %2017 = vmatpush3.bf16.msra.mxu0 %v1146_v44 }
 0x481   : > { %2028 = vmatprep.subr.bf16.mxu0 %v2582_v9  ;;  %2238 = vpow2.f32 %v1131_v43 }
 0x482   : > { %v1244_v38 = vpop.xlane.xlu1 %1243  ;;  %2049 = vmatpush3.bf16.msra.mxu1 %v2225_v42 }
 0x483   : > { %v1245_v45 = vmax.f32 %v1244_v38, -1e+30  ;;  %2062 = vmatprep.subr.bf16.mxu1 %v2582_v9 }
 0x485   : > { %v1249_v46 = vsub.f32 %v1237_v20, %v1245_v45  ;;  %v1246_v18 = vsub.f32 -1e+30, %v1245_v45 }
 0x487   : > { %v1250_v47 = vmul.f32 1.442695, %v1249_v46  ;;  %v1247_v19 = vmul.f32 1.442695, %v1246_v18  ;;  %v2226_v18 = vld [vmem:[#allocation14 + $0x8] sm:$0xff]  }
 0x489   : > { %2240 = vpow2.f32 %v1250_v47 }
 0x48a   : > { %v1362_v48 = vpop.xlane.xlu1 %1361 }
 0x48b   : > { %v1363_v49 = vmax.f32 %v1362_v48, -1e+30 }
 0x48d   : > { %v1367_v50 = vsub.f32 %v1355_v26, %v1363_v49  ;;  %v1364_v20 = vsub.f32 -1e+30, %v1363_v49 }
 0x48e   : > { %v2239_v51 = vpop.eup %2238  ;;  %v1377_v57 = vpop.permute.xlu1 %1376 }
 0x48f   : > { %v1368_v52 = vmul.f32 1.442695, %v1367_v50  ;;  %v1134_v53 = vsel %vm957_vm4, %v2239_v51, 0.0  ;;  %v1138_v54 = vpack.c.bf16 %v2239_v51, %v2239_v51  ;;  %v1382_v60 = vsel %vm1023_vm5, %v1377_v57, 0 }
 0x490   : > { %1135 = vadd.xlane.f32.xlu0 %v1134_v53  ;;  %v1365_v22 = vmul.f32 1.442695, %v1364_v20  ;;  %v2229_v20 = vld [vmem:[%s3116_s16 + $0x10] sm:$0xff]  }
 0x491   : > { %2242 = vpow2.f32 %v1368_v52  ;;  %2019 = vmatmul.mubr.msk.bf16.vlgmr.msra.gmra.mxu0 %vm957_vm4, %v1138_v54 }
 0x492   : > { %2029 = vmatpush3.bf16.msra.mxu0 %v1264_v55  ;;  %2030 = vmatprep.mubr.msk.bf16.mxu0 %vm2583_vm1, %v2582_v9  ;;  %2244 = vpow2.f32 %v1009_v3 }
 0x493   : > { %2040 = vmatprep.subr.bf16.mxu0 %v2582_v9  ;;  %2246 = vpow2.f32 %v1128_v15 }
 0x496   : > { %v2241_v56 = vpop.eup %2240 }
 0x497   : > { %v1253_v58 = vsel %vm957_vm4, %v2241_v56, 0.0  ;;  %v1257_v59 = vpack.c.bf16 %v2241_v56, %v2241_v56 }
 0x498   : > { %1254 = vadd.xlane.f32.xlu1 %v1253_v58 }
 0x499   : > { %2031 = vmatmul.mubr.msk.bf16.vlgmr.msra.gmra.mxu0 %vm957_vm4, %v1257_v59 }
 0x49a   : > { %2041 = vmatpush3.bf16.msra.mxu0 %v1382_v60  ;;  %2042 = vmatprep.mubr.msk.bf16.mxu0 %vm2583_vm1, %v2582_v9 }
 0x49b   : > { %2054 = vmatprep.subr.bf16.mxu0 %v2582_v9 }
 0x49e   : > { %v2243_v61 = vpop.eup %2242 }
 0x49f   : > { %v1371_v62 = vsel %vm957_vm4, %v2243_v61, 0.0  ;;  %v1375_v63 = vpack.c.bf16 %v2243_v61, %v2243_v61  ;;  %v2245_v4 = vpop.eup %2244 }
 0x4a0   : > { %1372 = vadd.xlane.f32.xlu0 %v1371_v62  ;;  %v1014_v5 = vmul.f32 0.0, %v2245_v4  ;;  %v2247_v21 = vpop.eup %2246 }
 0x4a1   : > { %2043 = vmatmul.mubr.msk.bf16.vlgmr.msra.gmra.mxu0 %vm957_vm4, %v1375_v63  ;;  %v1133_v25 = vmul.f32 0.0, %v2247_v21 }
 0x4a2   : > { %2058 = vmatprep.mubr.msk.bf16.mxu0 %vm2583_vm1, %v2582_v9  ;;  %2055 = vmatpush3.bf16.msra.mxu0 %v2226_v18 }
 0x4a3   : > { %2056 = vmatprep.subr.bf16.mxu0 %v2582_v9 }
 0x4a4   : > { %1016 = vadd.xlane.f32.xlu0 %v1015_v1 }
 0x4de   : > { %v1061_v6 = vpop.f32.mrf.mxu0 }
 0x4df   : > { %v1067_v7 = vadd.f32 %v1061_v6, %v1014_v5 }
 0x4e0   : > { %v2008_v8 = vpop.f32.mrf.mxu0 }
 0x4e2   : > { %v1064_v10 = vpop.f32.mrf.mxu0 }
 0x4e4   : > { %v2009_v11 = vpop.f32.mrf.mxu0 }
 0x519   : > { %v1136_v12 = vpop.xlane.xlu0 %1135 }
 0x51a   : > { %v1137_v26 = vadd.f32 %v1136_v12, %v1133_v25 }
 0x521   : > { %v1255_v28 = vpop.xlane.xlu1 %1254 }
 0x529   : > { %v1373_v14 = vpop.xlane.xlu0 %1372 }
 0x52d   : > { %v1017_v16 = vpop.xlane.xlu0 %1016 }
 0x52e   : > { %v1018_v17 = vadd.f32 %v1017_v16, %v1014_v5  ;;  %v1921_v5 = vld [vmem:[%s3111_s11] ss:$0 sm:$0xff] }
 0x530   : > { %2248 = vrcp.f32 %v1018_v17 }
 0x531   : > { %2250 = vpow2.f32 %v1247_v19  ;;  %v2228_v19 = vld [vmem:[%s3116_s16 + $0x18] sm:$0xff]  }
 0x532   : > { %2252 = vpow2.f32 %v1365_v22 }
 0x533   : > { %2254 = vrcp.f32 %v1137_v26 }
 0x53d   : > { %v2249_v23 = vpop.eup %2248 }
 0x53e   : > { %v1069_v24 = vmul.f32 %v2249_v23, %v1067_v7  ;;  %v2251_v27 = vpop.eup %2250 }
 0x53f   : > { %v1252_v29 = vmul.f32 0.0, %v2251_v27  ;;  %v2253_v31 = vpop.eup %2252 }
 0x540   : > { %v1370_v32 = vmul.f32 0.0, %v2253_v31  ;;  %v2255_v36 = vpop.eup %2254  ;;  %v1070_v61 = vpack.c.bf16 %v1069_v24, %v1069_v24 }
 0x541   : > { %v1256_v30 = vadd.f32 %v1255_v28, %v1252_v29 }
 0x542   : > { %v1374_v34 = vadd.f32 %v1373_v14, %v1370_v32 }
 0x543   : > { %2256 = vrcp.f32 %v1256_v30 }
 0x544   : > { %2258 = vrcp.f32 %v1374_v34 }
 0x550   : > { %v2257_v46 = vpop.eup %2256 }
 0x551   : > { %v1182_v33 = vpop.f32.mrf.mxu0  ;;  %v2259_v54 = vpop.eup %2258 }
 0x552   : > { %v1188_v35 = vadd.f32 %v1182_v33, %v1133_v25 }
 0x553   : > { %v2020_v37 = vpop.f32.mrf.mxu0 }
 0x554   : > { %v1190_v40 = vmul.f32 %v2255_v36, %v1188_v35  ;;  %v2230_v36 = vld [vmem:[%s3116_s16 + $0x8] sm:$0xff]   ;;  %v2231_v37 = vld [vmem:[%s3116_s16] sm:$0xff]  }
 0x555   : > { %v1185_v41 = vpop.f32.mrf.mxu0 }
 0x556   : > { %v1191_v43 = vpack.c.bf16 %v1190_v40, %v1190_v40 }
 0x557   : > { %v2021_v44 = vpop.f32.mrf.mxu0 }
 0x558   : > { %1429 = vrot.lane.b32.xlu1 %v1191_v43, %s2588_s13  ;;  %s3051_s13 = scalar_lea.hbm %s3168_s17, %s1935_s3 }
 0x559   : > { %v1300_v38 = vpop.f32.mrf.mxu0 }
 0x55a   : > { %v1306_v45 = vadd.f32 %v1300_v38, %v1252_v29  ;;  %v1922_v29 = vld [vmem:[%s3164_s9] ss:$0 sm:$0xff]  ;;  %s706_s9 = scalar_lea.vmem [#allocation16], %s1894_s25 }
 0x55b   : > { %v2032_v47 = vpop.f32.mrf.mxu0  ;;  %s1719_s14 = sshll.u32 %s706_s9, 4  ;;  %s3053_s14 = int_to_ptr.vmem [resolvable:$true] %s1719_s14 }
 0x55c   : > { %v1308_v48 = vmul.f32 %v2257_v46, %v1306_v45  ;;  %v1933_v46 = vld [vmem:[%s3167_s8] ss:$0 sm:$0xff] }
 0x55d   : > { %v1303_v49 = vpop.f32.mrf.mxu0 }
 0x55e   : > { %v1309_v50 = vpack.c.bf16 %v1308_v48, %v1308_v48 }
 0x55f   : > { %v2033_v51 = vpop.f32.mrf.mxu0 }
 0x560   : > { %1432 = vrot.lane.b32.xlu0 %v1309_v50, %s2589_s20  ;;  %s2474_s20 = scalar_lea.vmem %s3053_s14, 128 }
 0x561   : > { %v1418_v52 = vpop.f32.mrf.mxu0  ;;  %p2475_p8 = scmp.ne.s32.totalorder %s3053_s14, %s2474_s20 }
 0x562   : > { %v1424_v53 = vadd.f32 %v1418_v52, %v1370_v32  ;;  %v1923_v32 = vld [vmem:[%s3165_s22] ss:$0 sm:$0xff] }
 0x563   : > { %v2044_v55 = vpop.f32.mrf.mxu0  ;;  %p2476_p7 = pnand %p2475_p8, %p2831_p4 }
 0x564   : > { %v1426_v56 = vmul.f32 %v2259_v54, %v1424_v53 }
 0x565   : > { %v1421_v57 = vpop.f32.mrf.mxu0  ;;  %p2477_p9 = pneg %p2476_p7 }
 0x566   : > { %v1427_v58 = vpack.c.bf16 %v1426_v56, %v1426_v56 }
 0x567   : > { %v2045_v59 = vpop.f32.mrf.mxu0 }
 0x568   : > { %1435 = vrot.lane.b32.xlu1 %v1427_v58, %s2590_s12  ;;  %s2591_s12 = smov [#allocation16]  }
 0x569   : > { %s2478_s18 = sshll.u32 %s2591_s12, 4  ;;  %s2479_s18 = int_to_ptr.vmem [resolvable:$false] %s2478_s18 }
 0x56a   : > { %s2480_s2 = scalar_lea.vmem %s2479_s18, 256  ;;  %p2481_p10 = scmp.lt.s32.totalorder %s3053_s14, %s2479_s18 }
 0x56b   : > { %p2482_p11 = scmp.lt.s32.totalorder %s2480_s2, %s2474_s20 }
 0x56d   : > { %p2483_p13 = por %p2482_p11, %p2481_p10 }
 0x56f   : > { %p2484_p0 = pnand %p2483_p13, %p2477_p9 }
 0x5ca   : > { %v1430_v60 = vpop.permute.xlu1 %1429 }
 0x5cb   : > { %v1439_v63 = vsel %vm957_vm4, %v1070_v61, %v1430_v60 }
 0x5d2   : > { %v1433_v62 = vpop.permute.xlu0 %1432 }
 0x5d3   : > { %v1442_v1 = vsel %vm1440_vm7, %v1439_v63, %v1433_v62 }
 0x5da   : > { %v1436_v2 = vpop.permute.xlu1 %1435 }
 0x5db   : > { %v1445_v3 = vsel %vm1443_vm8, %v1442_v1, %v1436_v2 }
 0x5dc   : > { %2051 = vmatmul.mubr.msk.bf16.vlgmr.msra.gmra.mxu1 %vm715_vm0, %v1445_v3 }
 0x5dd   : > { %2070 = vmatprep.mubr.msk.bf16.mxu1 %vm2583_vm1, %v2582_v9  ;;  %2063 = vmatpush3.bf16.msra.mxu1 %v2228_v19 }
 0x5de   : > { %2064 = vmatprep.subr.bf16.mxu1 %v2582_v9 }
 0x5e1   : > { %2065 = vmatpush3.bf16.msra.mxu1 %v2229_v20 }
 0x5e2   : > { %2066 = vmatprep.subr.bf16.mxu1 %v2582_v9 }
 0x5e5   : > { %2067 = vmatpush3.bf16.msra.mxu1 %v2230_v36 }
 0x5e6   : > { %2068 = vmatprep.subr.bf16.mxu1 %v2582_v9 }
 0x5e9   : > { %2069 = vmatpush3.bf16.msra.mxu1 %v2231_v37 }
 0x69c   : > { %v1498_v4 = vpop.f32.mrf.mxu1 }
 0x69d   : > { %v1504_v6 = vadd.f32 %v1498_v4, %v2890_v0  ;;  %v2227_v0 = vld [vmem:[#allocation14] sm:$0xff]  }
 0x69e   : > { %v2052_v7 = vpop.f32.mrf.mxu1  ;;  %2057 = vmatpush3.bf16.msra.mxu0 %v2227_v0 }
 0x69f   : > { %v3010_v8 = vadd.f32 %v1921_v5, %v1504_v6 }
 0x6a0   : > { %v1501_v10 = vpop.f32.mrf.mxu1 }
 0x6a1   : > { %v1515_v11 = vsel %vm715_vm0, %v3010_v8, 0.0 }
 0x6a2   : > { %1516 = vadd.xlane.f32.xlu1 %v1515_v11  ;;  %v2053_v12 = vpop.f32.mrf.mxu1 }
 0x72b   : > { %v1517_v13 = vpop.xlane.xlu1 %1516 }
 0x72c   : > { %v1518_v14 = vmul.f32 0.03125, %v1517_v13 }
 0x72e   : > { %v1519_v15 = vsub.f32 %v3010_v8, %v1518_v14 }
 0x730   : > { %v1520_v16 = vmul.f32 %v1519_v15, %v1519_v15  ;;  %v1531_v30 = vmul.f32 %v1922_v29, %v1519_v15 }
 0x732   : > { %v1521_v17 = vsel %vm715_vm0, %v1520_v16, 0.0 }
 0x733   : > { %1522 = vadd.xlane.f32.xlu0 %v1521_v17 }
 0x7bc   : > { %v1523_v21 = vpop.xlane.xlu0 %1522 }
 0x7bd   : > { %v1524_v22 = vmul.f32 0.032258064, %v1523_v21 }
 0x7bf   : > { %2260 = vrsqrt.f32 %v1524_v22  ;;  %vm1534_vm9 = vcmp.eq.f32.partialorder %v1524_v22, inf  ;;  %v1537_v25 = vand.u32 2147483648, %v1524_v22  ;;  %vm1536_vm10 = vcmp.eq.f32.partialorder %v1524_v22, 0.0 }
 0x7cc   : > { %v2261_v23 = vpop.eup %2260 }
 0x7cd   : > { %v1533_v24 = vmul.f32 %v2261_v23, %v1524_v22 }
 0x7cf   : > { %v1535_v26 = vsel %vm1534_vm9, %v1524_v22, %v1533_v24 }
 0x7d0   : > { %v1538_v27 = vsel %vm1536_vm10, %v1537_v25, %v1535_v26 }
 0x7d1   : > { %v1539_v28 = vadd.f32 1e-06, %v1538_v27 }
 0x7d3   : > { %2262 = vrcp.f32 %v1539_v28 }
 0x7e0   : > { %v2263_v31 = vpop.eup %2262 }
 0x7e1   : > { %v1541_v33 = vmul.f32 %v2263_v31, %v1531_v30 }
 0x7e3   : > { %v1548_v34 = vadd.f32 %v1923_v32, %v1541_v33 }
 0x7e5   : > { %v1549_v35 = vpack.c.bf16 %v1548_v34, %v1548_v34 }
 0x7e7   : > { %2059 = vmatmul.mubr.msk.bf16.vlgmr.msra.gmra.mxu0 %vm715_vm0, %v1549_v35 }
 0x8a7   : > { %v1610_v40 = vpop.f32.mrf.mxu0 }
 0x8a8   : > { %v1611_v41 = vadd.f32 %v1924_v39, %v1610_v40 }
 0x8a9   : > { %v2060_v42 = vpop.f32.mrf.mxu0 }
 0x8aa   : > { %v1616_v43 = vmax.f32 %v1611_v41, 0.0 }
 0x8ab   : > { %v1613_v44 = vpop.f32.mrf.mxu0 }
 0x8ac   : > { %v1617_v38 = vpack.c.bf16 %v1616_v43, %v1616_v43 }
 0x8ad   : > { %v2061_v45 = vpop.f32.mrf.mxu0 }
 0x8ae   : > { %2071 = vmatmul.mubr.msk.bf16.vlgmr.msra.gmra.mxu1 %vm1650_vm11, %v1617_v38 }
 0x96e   : > { %v1688_v9 = vpop.f32.mrf.mxu1 }
 0x96f   : > { %v1694_v47 = vadd.f32 %v1688_v9, %v3010_v8 }
 0x970   : > { %v2072_v48 = vpop.f32.mrf.mxu1 }
 0x971   : > { %v1702_v49 = vadd.f32 %v1933_v46, %v1694_v47 }
 0x972   : > { %v1691_v50 = vpop.f32.mrf.mxu1 }
 0x973   : > { %1703 = vst.msk [vmem:[%s706_s9] sm:$0xff] %vm715_vm0, %v1702_v49 }
 0x974   : > { %v2073_v51 = vpop.f32.mrf.mxu1 }
 0x975   : > { %2487 = shalt.err (!%p2484_p0)
}
 0x976   : > { %s2488_s1 = scalar_lea.hbm %s3051_s13, 128  ;;  %s2492_s15 = scalar_lea.hbm %s3168_s17, 256 }
 0x977   : > { %p2489_p3 = scmp.ne.s32.totalorder %s3051_s13, %s2488_s1  ;;  %p2493_p2 = scmp.lt.s32.totalorder %s3051_s13, %s3168_s17 }
 0x978   : > { %p2494_p6 = scmp.lt.s32.totalorder %s2492_s15, %s2488_s1 }
 0x979   : > { %p2490_p1 = pnand %p2489_p3, %p2831_p4 }
 0x97a   : > { %p2495_p8 = por %p2494_p6, %p2493_p2 }
 0x97b   : > { %p2491_p12 = pneg %p2490_p1 }
 0x97d   : > { %p2496_p7 = pnand %p2495_p8, %p2491_p12 }
 0x97f   : > { %2499 = shalt.err (!%p2496_p7)
}
 0x980   : > { %2104 = dma.vmem_to_hbm [thread:$0]  (%p2831_p4), %s3053_s14, 128, %s3051_s13, %s1705_s30  }
 0x981 PF: > { %s1731_s3 = sand.u32 1, %s2550_s27   ;;  %p3169_p9 = scmp.ge.s32.totalorder %s2570_s19, 2 }
 0x982   : > { %s1732_s9 = scalar_lea.sflag [#allocation4], %s1731_s3 }
 0x983   : > { %p2133_p10 = pnand %p3169_p9, %p2839_p5 }
 0x985   : > { %p2134_p11 = pneg %p2133_p10 }
 0x987   : > { %2545 = dma.done.wait (%p2134_p11), %s1732_s9, 128  }
 0x988   : > { %2547 = vsyncadd (%p2134_p11), %s1732_s9, 4294967168  ;;  %s38_s19 = sadd.s32 1, %s2570_s19   ;;  %s3170_s24 = sld [smem:[#allocation23_spill]] }
 0x989   : > { %p35_p13 = scmp.ge.s32.totalorder %s38_s19, 4   ;;  %s3171_s27 = smov %s2554_s28 }
 0x98a   : > { %s3172_s28 = smov %s2558_s29  ;;  %s3173_s29 = smov %s2837_s23 }
 0x98b   : > { %s3174_s30 = smov %s2566_s0  ;;  %37 = sbr.rel (!%p35_p13) target bundleno = 25 (0x19), region = 168 }
 0x98e   : > { %s3175_s0 = smov %s3170_s24 }
 0x990   :  { %1737 = vsyncpa [#allocation3], 1 }
 0x991   :  { %1739 = vsyncpa [#allocation3 + $0x1], 1 }
 0x992   :  { %1740 = vsyncpa [#allocation6], 1 }
 0x993   :  { %1741 = vsyncpa [#allocation9], 1 }
 0x994   :  { %1742 = vsyncpa [#allocation12], 1 }
 0x995   :  { %1743 = vsyncpa [#allocation15], 1 }
 0x996   :  { %1744 = vsyncpa [#allocation4], 1 }
 0x997   :  { %1746 = vsyncpa [#allocation4 + $0x1], 1 }

</bundles_post_ra>
